<compile_context>
chip_gen: v6e
topology: v6e:2x2x1
jax: 0.10.0
libtpu: 0.0.40
codegen_flags: <defaults>
</compile_context>

<pallas_src>
import functools

import jax
import jax.numpy as jnp
import numpy as np
from jax.experimental import pallas as pl
from jax.experimental.pallas import tpu as pltpu

EPS = 1e-5


def _residual_block_kernel(x_ref, shift_ref, band1_ref, band2_ref,
                           g1_ref, b1_ref, g2_ref, b2_ref, out_ref,
                           *, channels, hw_count):
    # x_ref    : (R, WC)        lane-dense rows, R = images_per_block * H
    # shift_ref: (3, R, R)      [row-shift up, row-shift down, same-image sum] 0/1
    # band*_ref: (3*WC, WC)     K-stacked banded conv weights
    # g*/b*    : (1, WC)        InstanceNorm affine params pre-tiled to lane width
    # out_ref  : (R, WC)
    x = x_ref[...]
    WC = x.shape[1]

    s_up = shift_ref[0]      # (S_up   @ y)[r] = y[r-1] within the image, 0 at top
    s_down = shift_ref[1]    # (S_down @ y)[r] = y[r+1] within the image, 0 at bottom
    p_img = shift_ref[2]     # (P_img  @ y)[r] = sum over rows of the same image

    inv_count = 1.0 / hw_count

    def conv3x3(y, band_ref):
        up = jnp.dot(s_up, y, preferred_element_type=jnp.float32)
        down = jnp.dot(s_down, y, preferred_element_type=jnp.float32)
        stacked = jnp.concatenate([up, y, down], axis=1)          # (R, 3*WC)
        return jnp.dot(stacked.astype(band_ref.dtype), band_ref[...],
                       preferred_element_type=jnp.float32)        # (R, WC)

    def channel_sum(t):
        # Lane-axis all-reduce over the W positions (channels interleaved with
        # stride C on the lanes) via log2(W) circular rolls on the XLU.
        step = channels
        while step < WC:
            t = t + pltpu.roll(t, shift=step, axis=1)             # positive axis!
            step *= 2
        return t

    def inst_norm(y, g, b):
        row_tot = jnp.dot(p_img, y, preferred_element_type=jnp.float32)
        mean = channel_sum(row_tot) * inv_count
        yc = y - mean
        sq_tot = jnp.dot(p_img, yc * yc, preferred_element_type=jnp.float32)
        var = channel_sum(sq_tot) * inv_count
        return yc * (jax.lax.rsqrt(var + EPS) * g) + b

    y = conv3x3(x, band1_ref)
    y = inst_norm(y, g1_ref[...], b1_ref[...])
    y = jnp.maximum(y, 0.0)

    y = conv3x3(y, band2_ref)
    y = inst_norm(y, g2_ref[...], b2_ref[...])

    out_ref[...] = x + y


def _banded_weights(w, width, dtype):
    """(Cout, Cin, 3, 3) OIHW conv weight -> K-stacked (3*W*Cin, W*Cout) band matrix.

    band[dy][wi*Cin + ci, wo*Cout + co] = w[co, ci, dy, wi - wo + 1] for |wi-wo|<=1,
    else 0; the three dy blocks are stacked along K so each conv is one matmul.
    """
    cout, cin = int(w.shape[0]), int(w.shape[1])
    w_t = jnp.transpose(w, (2, 3, 1, 0)).astype(jnp.float32)       # (kh, kw, Cin, Cout)
    wi = np.arange(width)[:, None, None]
    wo = np.arange(width)[None, :, None]
    dx = np.arange(3)[None, None, :]
    sel = jnp.asarray((wi == wo + dx - 1).astype(np.float32))      # (W, W, 3) 0/1
    band = jnp.einsum('iod,ydxc->yixoc', sel, w_t,
                      precision=jax.lax.Precision.HIGHEST)         # (3, W, Cin, W, Cout)
    return band.reshape(3 * width * cin, width * cout).astype(dtype)


def _shift_matrices(num_images, height):
    """Block-diagonal (per-image) row-shift and row-sum 0/1 matrices, built once."""
    r = num_images * height
    ri = np.arange(r)[:, None]
    rj = np.arange(r)[None, :]
    same = (ri // height) == (rj // height)
    s_up = ((rj == ri - 1) & same).astype(np.float32)
    s_down = ((rj == ri + 1) & same).astype(np.float32)
    p_img = same.astype(np.float32)
    return jnp.asarray(np.stack([s_up, s_down, p_img], axis=0))    # (3, R, R)


def residual_block_lane_dense(x_ld, w1, w2, g1, b1, g2, b2, *,
                              num_images, height, width, channels,
                              band_dtype=jnp.float32, images_per_block=None):
    """Lane-dense entry point: x_ld is (num_images*height, width*channels) f32.

    Use this form to chain residual blocks without NCHW round-trips.
    """
    if images_per_block is None:
        images_per_block = num_images        # fuse the whole batch per grid step
    assert num_images % images_per_block == 0
    wc = width * channels
    rows_blk = images_per_block * height
    assert wc % 128 == 0, "W*C must be a multiple of 128 (pad deliberately otherwise)"
    assert (width & (width - 1)) == 0, "W must be a power of two for the lane roll-reduce"
    assert rows_blk % 8 == 0

    band1 = _banded_weights(w1, width, band_dtype)                 # (3*WC, WC)
    band2 = _banded_weights(w2, width, band_dtype)
    shifts = _shift_matrices(images_per_block, height)             # (3, Rb, Rb)
    g1w = jnp.tile(g1.astype(jnp.float32), width).reshape(1, wc)
    b1w = jnp.tile(b1.astype(jnp.float32), width).reshape(1, wc)
    g2w = jnp.tile(g2.astype(jnp.float32), width).reshape(1, wc)
    b2w = jnp.tile(b2.astype(jnp.float32), width).reshape(1, wc)

    kernel = functools.partial(_residual_block_kernel,
                               channels=channels, hw_count=height * width)
    grid = (num_images // images_per_block,)

    const2 = lambda n: (0, 0)
    const3 = lambda n: (0, 0, 0)

    return pl.pallas_call(
        kernel,
        out_shape=jax.ShapeDtypeStruct((num_images * height, wc), jnp.float32),
        grid_spec=pltpu.PrefetchScalarGridSpec(
            num_scalar_prefetch=0,
            grid=grid,
            in_specs=[
                pl.BlockSpec((rows_blk, wc), lambda n: (n, 0)),            # x
                pl.BlockSpec((3, rows_blk, rows_blk), const3),             # shifts
                pl.BlockSpec((3 * wc, wc), const2),                        # band1
                pl.BlockSpec((3 * wc, wc), const2),                        # band2
                pl.BlockSpec((1, wc), const2),                             # g1
                pl.BlockSpec((1, wc), const2),                             # b1
                pl.BlockSpec((1, wc), const2),                             # g2
                pl.BlockSpec((1, wc), const2),                             # b2
            ],
            out_specs=pl.BlockSpec((rows_blk, wc), lambda n: (n, 0)),
        ),
        compiler_params=pltpu.CompilerParams(
            dimension_semantics=("parallel",),
            vmem_limit_bytes=32 * 1024 * 1024,
        ),
    )(x_ld, shifts, band1, band2, g1w, b1w, g2w, b2w)


def residual_block(x_nchw, w1, w2, g1, b1, g2, b2, *, band_dtype=jnp.float32):
    """NCHW convenience wrapper.  x: (N,C,H,W); w: (C,C,3,3) OIHW; g/b: (C,).

    When stacking several residual blocks, prefer residual_block_lane_dense and
    keep the lane-dense layout across blocks instead of paying these transposes.
    """
    N, C, H, W = x_nchw.shape
    wc = W * C
    x_ld = jnp.transpose(x_nchw, (0, 2, 3, 1)).reshape(N * H, wc).astype(jnp.float32)
    out_ld = residual_block_lane_dense(
        x_ld, w1, w2, g1, b1, g2, b2,
        num_images=N, height=H, width=W, channels=C, band_dtype=band_dtype)
    return jnp.transpose(out_ld.reshape(N, H, W, C), (0, 3, 1, 2))


def residual_block_reference(x, w1, w2, g1, b1, g2, b2):
    """Pure-JAX reference (NCHW), mirroring the PyTorch module forward (train mode)."""
    def conv(h, w):
        return jax.lax.conv_general_dilated(
            h, w, window_strides=(1, 1), padding=((1, 1), (1, 1)),
            dimension_numbers=("NCHW", "OIHW", "NCHW"))

    def inorm(h, g, b):
        mean = h.mean(axis=(2, 3), keepdims=True)
        var = ((h - mean) ** 2).mean(axis=(2, 3), keepdims=True)
        inv = 1.0 / jnp.sqrt(var + EPS)
        return (h - mean) * inv * g.reshape(1, -1, 1, 1) + b.reshape(1, -1, 1, 1)

    h = conv(x, w1)
    h = inorm(h, g1, b1)
    h = jnp.maximum(h, 0.0)
    h = conv(h, w2)
    h = inorm(h, g2, b2)
    return x + h


if __name__ == "__main__":
    # ResidualBlock(dim_in=dim_out=8) on a (2, 8, 16, 16) input -> W*C = 128 lanes.
    N, C, H, W = 2, 8, 16, 16
    key = jax.random.PRNGKey(0)
    kx, kw1, kw2, kg1, kb1, kg2, kb2 = jax.random.split(key, 7)

    x = jax.random.normal(kx, (N, C, H, W), jnp.float32)
    w1 = jax.random.normal(kw1, (C, C, 3, 3), jnp.float32) * 0.1   # Conv2d(dim_in, dim_out, 3)
    w2 = jax.random.normal(kw2, (C, C, 3, 3), jnp.float32) * 0.1   # Conv2d(dim_out, dim_out, 3)
    g1 = 1.0 + 0.1 * jax.random.normal(kg1, (C,), jnp.float32)     # InstanceNorm affine weight
    b1 = 0.1 * jax.random.normal(kb1, (C,), jnp.float32)           # InstanceNorm affine bias
    g2 = 1.0 + 0.1 * jax.random.normal(kg2, (C,), jnp.float32)
    b2 = 0.1 * jax.random.normal(kb2, (C,), jnp.float32)

    out = residual_block(x, w1, w2, g1, b1, g2, b2)
    out = jax.block_until_ready(out)

    ref = jax.block_until_ready(residual_block_reference(x, w1, w2, g1, b1, g2, b2))
    np.testing.assert_allclose(np.asarray(out), np.asarray(ref), rtol=2e-3, atol=2e-3)

    print("KERNEL_OK")
</pallas_src>

<mosaic_0001>
module attributes {stable_mosaic.version = 11 : i64} {
  func.func @_residual_block_kernel(%arg0: i32, %arg1: memref<32x128xf32, #tpu.memory_space<vmem>>, %arg2: memref<3x32x32xf32, #tpu.memory_space<vmem>>, %arg3: memref<384x128xf32, #tpu.memory_space<vmem>>, %arg4: memref<384x128xf32, #tpu.memory_space<vmem>>, %arg5: memref<1x128xf32, #tpu.memory_space<vmem>>, %arg6: memref<1x128xf32, #tpu.memory_space<vmem>>, %arg7: memref<1x128xf32, #tpu.memory_space<vmem>>, %arg8: memref<1x128xf32, #tpu.memory_space<vmem>>, %arg9: memref<32x128xf32, #tpu.memory_space<vmem>>) attributes {dimension_semantics = [#tpu.dimension_semantics<parallel>], iteration_bounds = array<i64: 1>, scalar_prefetch = 0 : i64, scratch_operands = 0 : i64, tpu.core_type = #tpu.core_type<tc>, window_params = [{transform_indices = @transform_0, window_bounds = array<i64: 32, 128>}, {pipeline_mode = #tpu.pipeline_mode<synchronous>, transform_indices = @transform_1, window_bounds = array<i64: 3, 32, 32>}, {pipeline_mode = #tpu.pipeline_mode<synchronous>, transform_indices = @transform_2, window_bounds = array<i64: 384, 128>}, {pipeline_mode = #tpu.pipeline_mode<synchronous>, transform_indices = @transform_3, window_bounds = array<i64: 384, 128>}, {pipeline_mode = #tpu.pipeline_mode<synchronous>, transform_indices = @transform_4, window_bounds = array<i64: 1, 128>}, {pipeline_mode = #tpu.pipeline_mode<synchronous>, transform_indices = @transform_5, window_bounds = array<i64: 1, 128>}, {pipeline_mode = #tpu.pipeline_mode<synchronous>, transform_indices = @transform_6, window_bounds = array<i64: 1, 128>}, {pipeline_mode = #tpu.pipeline_mode<synchronous>, transform_indices = @transform_7, window_bounds = array<i64: 1, 128>}, {transform_indices = @transform_8, window_bounds = array<i64: 32, 128>}]} {
    %c0 = arith.constant 0 : index
    %c0_0 = arith.constant 0 : index
    %0 = vector.load %arg1[%c0, %c0_0] : memref<32x128xf32, #tpu.memory_space<vmem>>, vector<32x128xf32>
    %c0_1 = arith.constant 0 : index
    %c0_2 = arith.constant 0 : index
    %c0_3 = arith.constant 0 : index
    %1 = vector.load %arg2[%c0_1, %c0_2, %c0_3] : memref<3x32x32xf32, #tpu.memory_space<vmem>>, vector<1x32x32xf32>
    %2 = vector.shape_cast %1 : vector<1x32x32xf32> to vector<32x32xf32>
    %c1 = arith.constant 1 : index
    %c0_4 = arith.constant 0 : index
    %c0_5 = arith.constant 0 : index
    %3 = vector.load %arg2[%c1, %c0_4, %c0_5] : memref<3x32x32xf32, #tpu.memory_space<vmem>>, vector<1x32x32xf32>
    %4 = vector.shape_cast %3 : vector<1x32x32xf32> to vector<32x32xf32>
    %c2 = arith.constant 2 : index
    %c0_6 = arith.constant 0 : index
    %c0_7 = arith.constant 0 : index
    %5 = vector.load %arg2[%c2, %c0_6, %c0_7] : memref<3x32x32xf32, #tpu.memory_space<vmem>>, vector<1x32x32xf32>
    %6 = vector.shape_cast %5 : vector<1x32x32xf32> to vector<32x32xf32>
    %cst = arith.constant dense<0.000000e+00> : vector<32x128xf32>
    %7 = tpu.matmul %2, %0, %cst {dimension_numbers = #tpu.dot_dimension_numbers<[1], [0], [0], [1], [0, 0, 1, 1], [], []>} : vector<32x32xf32>, vector<32x128xf32>, vector<32x128xf32> -> vector<32x128xf32>
    %cst_8 = arith.constant dense<0.000000e+00> : vector<32x128xf32>
    %8 = tpu.matmul %4, %0, %cst_8 {dimension_numbers = #tpu.dot_dimension_numbers<[1], [0], [0], [1], [0, 0, 1, 1], [], []>} : vector<32x32xf32>, vector<32x128xf32>, vector<32x128xf32> -> vector<32x128xf32>
    %9 = tpu.concatenate %7, %0, %8 in 1 : vector<32x128xf32>, vector<32x128xf32>, vector<32x128xf32> -> vector<32x384xf32>
    %c0_9 = arith.constant 0 : index
    %c0_10 = arith.constant 0 : index
    %10 = vector.load %arg3[%c0_9, %c0_10] : memref<384x128xf32, #tpu.memory_space<vmem>>, vector<384x128xf32>
    %cst_11 = arith.constant dense<0.000000e+00> : vector<32x128xf32>
    %11 = tpu.matmul %9, %10, %cst_11 {dimension_numbers = #tpu.dot_dimension_numbers<[1], [0], [0], [1], [0, 0, 1, 1], [], []>} : vector<32x384xf32>, vector<384x128xf32>, vector<32x128xf32> -> vector<32x128xf32>
    %c0_12 = arith.constant 0 : index
    %c0_13 = arith.constant 0 : index
    %12 = vector.load %arg5[%c0_12, %c0_13] : memref<1x128xf32, #tpu.memory_space<vmem>>, vector<1x128xf32>
    %c0_14 = arith.constant 0 : index
    %c0_15 = arith.constant 0 : index
    %13 = vector.load %arg6[%c0_14, %c0_15] : memref<1x128xf32, #tpu.memory_space<vmem>>, vector<1x128xf32>
    %cst_16 = arith.constant dense<0.000000e+00> : vector<32x128xf32>
    %14 = tpu.matmul %6, %11, %cst_16 {dimension_numbers = #tpu.dot_dimension_numbers<[1], [0], [0], [1], [0, 0, 1, 1], [], []>} : vector<32x32xf32>, vector<32x128xf32>, vector<32x128xf32> -> vector<32x128xf32>
    %c8_i32 = arith.constant 8 : i32
    %15 = tpu.dynamic_rotate %14 by %c8_i32 dim 1 : vector<32x128xf32>, i32 -> vector<32x128xf32>
    %16 = arith.addf %14, %15 : vector<32x128xf32>
    %c16_i32 = arith.constant 16 : i32
    %17 = tpu.dynamic_rotate %16 by %c16_i32 dim 1 : vector<32x128xf32>, i32 -> vector<32x128xf32>
    %18 = arith.addf %16, %17 : vector<32x128xf32>
    %c32_i32 = arith.constant 32 : i32
    %19 = tpu.dynamic_rotate %18 by %c32_i32 dim 1 : vector<32x128xf32>, i32 -> vector<32x128xf32>
    %20 = arith.addf %18, %19 : vector<32x128xf32>
    %c64_i32 = arith.constant 64 : i32
    %21 = tpu.dynamic_rotate %20 by %c64_i32 dim 1 : vector<32x128xf32>, i32 -> vector<32x128xf32>
    %22 = arith.addf %20, %21 : vector<32x128xf32>
    %cst_17 = arith.constant 3.906250e-03 : f32
    %23 = vector.broadcast %cst_17 : f32 to vector<32x128xf32>
    %24 = arith.mulf %22, %23 : vector<32x128xf32>
    %25 = arith.subf %11, %24 : vector<32x128xf32>
    %26 = arith.mulf %25, %25 : vector<32x128xf32>
    %cst_18 = arith.constant dense<0.000000e+00> : vector<32x128xf32>
    %27 = tpu.matmul %6, %26, %cst_18 {dimension_numbers = #tpu.dot_dimension_numbers<[1], [0], [0], [1], [0, 0, 1, 1], [], []>} : vector<32x32xf32>, vector<32x128xf32>, vector<32x128xf32> -> vector<32x128xf32>
    %c8_i32_19 = arith.constant 8 : i32
    %28 = tpu.dynamic_rotate %27 by %c8_i32_19 dim 1 : vector<32x128xf32>, i32 -> vector<32x128xf32>
    %29 = arith.addf %27, %28 : vector<32x128xf32>
    %c16_i32_20 = arith.constant 16 : i32
    %30 = tpu.dynamic_rotate %29 by %c16_i32_20 dim 1 : vector<32x128xf32>, i32 -> vector<32x128xf32>
    %31 = arith.addf %29, %30 : vector<32x128xf32>
    %c32_i32_21 = arith.constant 32 : i32
    %32 = tpu.dynamic_rotate %31 by %c32_i32_21 dim 1 : vector<32x128xf32>, i32 -> vector<32x128xf32>
    %33 = arith.addf %31, %32 : vector<32x128xf32>
    %c64_i32_22 = arith.constant 64 : i32
    %34 = tpu.dynamic_rotate %33 by %c64_i32_22 dim 1 : vector<32x128xf32>, i32 -> vector<32x128xf32>
    %35 = arith.addf %33, %34 : vector<32x128xf32>
    %cst_23 = arith.constant 3.906250e-03 : f32
    %36 = vector.broadcast %cst_23 : f32 to vector<32x128xf32>
    %37 = arith.mulf %35, %36 : vector<32x128xf32>
    %cst_24 = arith.constant 9.99999974E-6 : f32
    %38 = vector.broadcast %cst_24 : f32 to vector<32x128xf32>
    %39 = arith.addf %37, %38 : vector<32x128xf32>
    %40 = math.rsqrt %39 : vector<32x128xf32>
    %41 = vector.broadcast %12 : vector<1x128xf32> to vector<32x128xf32>
    %42 = arith.mulf %40, %41 : vector<32x128xf32>
    %43 = arith.mulf %25, %42 : vector<32x128xf32>
    %44 = vector.broadcast %13 : vector<1x128xf32> to vector<32x128xf32>
    %45 = arith.addf %43, %44 : vector<32x128xf32>
    %cst_25 = arith.constant 0.000000e+00 : f32
    %46 = vector.broadcast %cst_25 : f32 to vector<32x128xf32>
    %47 = arith.maximumf %45, %46 : vector<32x128xf32>
    %cst_26 = arith.constant dense<0.000000e+00> : vector<32x128xf32>
    %48 = tpu.matmul %2, %47, %cst_26 {dimension_numbers = #tpu.dot_dimension_numbers<[1], [0], [0], [1], [0, 0, 1, 1], [], []>} : vector<32x32xf32>, vector<32x128xf32>, vector<32x128xf32> -> vector<32x128xf32>
    %cst_27 = arith.constant dense<0.000000e+00> : vector<32x128xf32>
    %49 = tpu.matmul %4, %47, %cst_27 {dimension_numbers = #tpu.dot_dimension_numbers<[1], [0], [0], [1], [0, 0, 1, 1], [], []>} : vector<32x32xf32>, vector<32x128xf32>, vector<32x128xf32> -> vector<32x128xf32>
    %50 = tpu.concatenate %48, %47, %49 in 1 : vector<32x128xf32>, vector<32x128xf32>, vector<32x128xf32> -> vector<32x384xf32>
    %c0_28 = arith.constant 0 : index
    %c0_29 = arith.constant 0 : index
    %51 = vector.load %arg4[%c0_28, %c0_29] : memref<384x128xf32, #tpu.memory_space<vmem>>, vector<384x128xf32>
    %cst_30 = arith.constant dense<0.000000e+00> : vector<32x128xf32>
    %52 = tpu.matmul %50, %51, %cst_30 {dimension_numbers = #tpu.dot_dimension_numbers<[1], [0], [0], [1], [0, 0, 1, 1], [], []>} : vector<32x384xf32>, vector<384x128xf32>, vector<32x128xf32> -> vector<32x128xf32>
    %c0_31 = arith.constant 0 : index
    %c0_32 = arith.constant 0 : index
    %53 = vector.load %arg7[%c0_31, %c0_32] : memref<1x128xf32, #tpu.memory_space<vmem>>, vector<1x128xf32>
    %c0_33 = arith.constant 0 : index
    %c0_34 = arith.constant 0 : index
    %54 = vector.load %arg8[%c0_33, %c0_34] : memref<1x128xf32, #tpu.memory_space<vmem>>, vector<1x128xf32>
    %cst_35 = arith.constant dense<0.000000e+00> : vector<32x128xf32>
    %55 = tpu.matmul %6, %52, %cst_35 {dimension_numbers = #tpu.dot_dimension_numbers<[1], [0], [0], [1], [0, 0, 1, 1], [], []>} : vector<32x32xf32>, vector<32x128xf32>, vector<32x128xf32> -> vector<32x128xf32>
    %c8_i32_36 = arith.constant 8 : i32
    %56 = tpu.dynamic_rotate %55 by %c8_i32_36 dim 1 : vector<32x128xf32>, i32 -> vector<32x128xf32>
    %57 = arith.addf %55, %56 : vector<32x128xf32>
    %c16_i32_37 = arith.constant 16 : i32
    %58 = tpu.dynamic_rotate %57 by %c16_i32_37 dim 1 : vector<32x128xf32>, i32 -> vector<32x128xf32>
    %59 = arith.addf %57, %58 : vector<32x128xf32>
    %c32_i32_38 = arith.constant 32 : i32
    %60 = tpu.dynamic_rotate %59 by %c32_i32_38 dim 1 : vector<32x128xf32>, i32 -> vector<32x128xf32>
    %61 = arith.addf %59, %60 : vector<32x128xf32>
    %c64_i32_39 = arith.constant 64 : i32
    %62 = tpu.dynamic_rotate %61 by %c64_i32_39 dim 1 : vector<32x128xf32>, i32 -> vector<32x128xf32>
    %63 = arith.addf %61, %62 : vector<32x128xf32>
    %cst_40 = arith.constant 3.906250e-03 : f32
    %64 = vector.broadcast %cst_40 : f32 to vector<32x128xf32>
    %65 = arith.mulf %63, %64 : vector<32x128xf32>
    %66 = arith.subf %52, %65 : vector<32x128xf32>
    %67 = arith.mulf %66, %66 : vector<32x128xf32>
    %cst_41 = arith.constant dense<0.000000e+00> : vector<32x128xf32>
    %68 = tpu.matmul %6, %67, %cst_41 {dimension_numbers = #tpu.dot_dimension_numbers<[1], [0], [0], [1], [0, 0, 1, 1], [], []>} : vector<32x32xf32>, vector<32x128xf32>, vector<32x128xf32> -> vector<32x128xf32>
    %c8_i32_42 = arith.constant 8 : i32
    %69 = tpu.dynamic_rotate %68 by %c8_i32_42 dim 1 : vector<32x128xf32>, i32 -> vector<32x128xf32>
    %70 = arith.addf %68, %69 : vector<32x128xf32>
    %c16_i32_43 = arith.constant 16 : i32
    %71 = tpu.dynamic_rotate %70 by %c16_i32_43 dim 1 : vector<32x128xf32>, i32 -> vector<32x128xf32>
    %72 = arith.addf %70, %71 : vector<32x128xf32>
    %c32_i32_44 = arith.constant 32 : i32
    %73 = tpu.dynamic_rotate %72 by %c32_i32_44 dim 1 : vector<32x128xf32>, i32 -> vector<32x128xf32>
    %74 = arith.addf %72, %73 : vector<32x128xf32>
    %c64_i32_45 = arith.constant 64 : i32
    %75 = tpu.dynamic_rotate %74 by %c64_i32_45 dim 1 : vector<32x128xf32>, i32 -> vector<32x128xf32>
    %76 = arith.addf %74, %75 : vector<32x128xf32>
    %cst_46 = arith.constant 3.906250e-03 : f32
    %77 = vector.broadcast %cst_46 : f32 to vector<32x128xf32>
    %78 = arith.mulf %76, %77 : vector<32x128xf32>
    %cst_47 = arith.constant 9.99999974E-6 : f32
    %79 = vector.broadcast %cst_47 : f32 to vector<32x128xf32>
    %80 = arith.addf %78, %79 : vector<32x128xf32>
    %81 = math.rsqrt %80 : vector<32x128xf32>
    %82 = vector.broadcast %53 : vector<1x128xf32> to vector<32x128xf32>
    %83 = arith.mulf %81, %82 : vector<32x128xf32>
    %84 = arith.mulf %66, %83 : vector<32x128xf32>
    %85 = vector.broadcast %54 : vector<1x128xf32> to vector<32x128xf32>
    %86 = arith.addf %84, %85 : vector<32x128xf32>
    %87 = arith.addf %0, %86 : vector<32x128xf32>
    %c0_48 = arith.constant 0 : index
    %c0_49 = arith.constant 0 : index
    %88 = vector.load %arg9[%c0_48, %c0_49] : memref<32x128xf32, #tpu.memory_space<vmem>>, vector<32x128xf32>
    tpu.vector_store %arg9[%c0_48, %c0_49], %87 {strides = array<i32>} : memref<32x128xf32, #tpu.memory_space<vmem>>, vector<32x128xf32>,
    return
  }
  func.func @transform_0(%arg0: i32) -> (i32, i32) {
    %c0_i32 = arith.constant 0 : i32
    %c0_i32_0 = arith.constant 0 : i32
    return %arg0, %c0_i32 : i32, i32
  }
  func.func @transform_1(%arg0: i32) -> (i32, i32, i32) {
    %c0_i32 = arith.constant 0 : i32
    %c0_i32_0 = arith.constant 0 : i32
    %c0_i32_1 = arith.constant 0 : i32
    %c0_i32_2 = arith.constant 0 : i32
    return %c0_i32, %c0_i32_0, %c0_i32_1 : i32, i32, i32
  }
  func.func @transform_2(%arg0: i32) -> (i32, i32) {
    %c0_i32 = arith.constant 0 : i32
    %c0_i32_0 = arith.constant 0 : i32
    %c0_i32_1 = arith.constant 0 : i32
    return %c0_i32, %c0_i32_0 : i32, i32
  }
  func.func @transform_3(%arg0: i32) -> (i32, i32) {
    %c0_i32 = arith.constant 0 : i32
    %c0_i32_0 = arith.constant 0 : i32
    %c0_i32_1 = arith.constant 0 : i32
    return %c0_i32, %c0_i32_0 : i32, i32
  }
  func.func @transform_4(%arg0: i32) -> (i32, i32) {
    %c0_i32 = arith.constant 0 : i32
    %c0_i32_0 = arith.constant 0 : i32
    %c0_i32_1 = arith.constant 0 : i32
    return %c0_i32, %c0_i32_0 : i32, i32
  }
  func.func @transform_5(%arg0: i32) -> (i32, i32) {
    %c0_i32 = arith.constant 0 : i32
    %c0_i32_0 = arith.constant 0 : i32
    %c0_i32_1 = arith.constant 0 : i32
    return %c0_i32, %c0_i32_0 : i32, i32
  }
  func.func @transform_6(%arg0: i32) -> (i32, i32) {
    %c0_i32 = arith.constant 0 : i32
    %c0_i32_0 = arith.constant 0 : i32
    %c0_i32_1 = arith.constant 0 : i32
    return %c0_i32, %c0_i32_0 : i32, i32
  }
  func.func @transform_7(%arg0: i32) -> (i32, i32) {
    %c0_i32 = arith.constant 0 : i32
    %c0_i32_0 = arith.constant 0 : i32
    %c0_i32_1 = arith.constant 0 : i32
    return %c0_i32, %c0_i32_0 : i32, i32
  }
  func.func @transform_8(%arg0: i32) -> (i32, i32) {
    %c0_i32 = arith.constant 0 : i32
    %c0_i32_0 = arith.constant 0 : i32
    return %arg0, %c0_i32 : i32, i32
  }
}

</mosaic_0001>

<bundles_post_ra>
// kernel: tpu_custom_call.1
= control target key start
LH: loop header
LB: loop body
LE: loop exit
PB: predicated region body
PF: predicated region fallthrough
CT: control target
= control target key end

     0   :  { %13 = vsyncpa [#allocation3], 0  ;;  %s2511_s0 = inlined_call_operand.hbm [shape: f32[32,128], index: 0, kind: input, shape index: {}]   ;;  %s2512_s1 = inlined_call_operand.hbm [shape: f32[3,32,32], index: 1, kind: input, shape index: {}]   ;;  %s2513_s2 = inlined_call_operand.hbm [shape: f32[384,128], index: 2, kind: input, shape index: {}]   ;;  %s2514_s3 = inlined_call_operand.hbm [shape: f32[384,128], index: 3, kind: input, shape index: {}]   ;;  %s2515_s4 = inlined_call_operand.vmem [shape: f32[1,128], index: 4, kind: input, shape index: {}]   ;;  %s2516_s5 = inlined_call_operand.vmem [shape: f32[1,128], index: 5, kind: input, shape index: {}]   ;;  %s2517_s6 = inlined_call_operand.vmem [shape: f32[1,128], index: 6, kind: input, shape index: {}]   ;;  %s2518_s7 = inlined_call_operand.vmem [shape: f32[1,128], index: 7, kind: input, shape index: {}]   ;;  %s2519_s8 = inlined_call_operand.hbm [shape: f32[32,128], index: 8, kind: output, shape index: {}]  }
   0x1   :  { %14 = vsyncpa [#allocation6], 0 }
   0x2   :  { %15 = vsyncpa [#allocation9], 0 }
   0x3   :  { %16 = vsyncpa [#allocation4], 0  ;;  %s2133_s27 = smov [#allocation5]   ;;  %s2134_s29 = smov [#allocation2]  }
   0x4   :  { %s34_s28 = sshll.u32 %s2133_s27, 4  ;;  %s22_s30 = sshll.u32 %s2134_s29, 4  ;;  %s35_s28 = int_to_ptr.vmem [resolvable:$true] %s34_s28  ;;  %s23_s30 = int_to_ptr.vmem [resolvable:$true] %s22_s30 }
   0x5   :  { %s2033_s9 = scalar_lea.vmem %s35_s28, 1536  ;;  %p2038_p1 = scmp.lt.s32.totalorder %s35_s28, %s35_s28 }
   0x6   :  { %p2034_p0 = scmp.ne.s32.totalorder %s35_s28, %s2033_s9  ;;  %p2039_p2 = scmp.lt.s32.totalorder %s2033_s9, %s2033_s9 }
   0x8   :  { %p2040_p3 = por %p2039_p2, %p2038_p1 }
   0xa   :  { %p2041_p4 = pnand %p2040_p3, %p2034_p0 }
   0xc   :  { %2044 = shalt.err (!%p2041_p4)
}
   0xd   :  { %s2135_s10 = smov 128   ;;  %s2136_s11 = smov 8  }
   0xe   :  { %40 = dma.hbm_to_vmem [thread:$0]  %s2512_s1, 1536, %s35_s28, [#allocation6], %s2135_s10, %s2135_s10, %s2136_s11  }
   0xf   :  { %s2053_s14 = scalar_lea.vmem %s23_s30, 512  ;;  %p2058_p6 = scmp.lt.s32.totalorder %s23_s30, %s23_s30 }
  0x10   :  { %p2054_p5 = scmp.ne.s32.totalorder %s23_s30, %s2053_s14  ;;  %p2059_p7 = scmp.lt.s32.totalorder %s2053_s14, %s2053_s14 }
  0x12   :  { %p2060_p8 = por %p2059_p7, %p2058_p6 }
  0x14   :  { %p2061_p9 = pnand %p2060_p8, %p2054_p5 }
  0x16   :  { %2064 = shalt.err (!%p2061_p9)
}
  0x17   :  { %28 = dma.hbm_to_vmem [thread:$0]  %s2511_s0, 512, %s23_s30, [#allocation3], %s2135_s10, %s2135_s10, %s2136_s11  }
  0x18   :  { %s2137_s17 = smov [#allocation7]   ;;  %s2138_s19 = smov [#allocation8]  }
  0x19   :  { %s46_s18 = sshll.u32 %s2137_s17, 4  ;;  %s58_s20 = sshll.u32 %s2138_s19, 4  ;;  %s47_s18 = int_to_ptr.vmem [resolvable:$true] %s46_s18  ;;  %s59_s20 = int_to_ptr.vmem [resolvable:$true] %s58_s20 }
  0x1a   :  { %s2073_s1 = scalar_lea.vmem %s47_s18, 6144  ;;  %p2078_p11 = scmp.lt.s32.totalorder %s47_s18, %s47_s18 }
  0x1b   :  { %p2074_p10 = scmp.ne.s32.totalorder %s47_s18, %s2073_s1  ;;  %p2079_p12 = scmp.lt.s32.totalorder %s2073_s1, %s2073_s1 }
  0x1d   :  { %p2080_p13 = por %p2079_p12, %p2078_p11 }
  0x1f   :  { %p2081_p0 = pnand %p2080_p13, %p2074_p10 }
  0x21   :  { %2084 = shalt.err (!%p2081_p0)
}
  0x22   :  { %52 = dma.hbm_to_vmem [thread:$0]  %s2513_s2, 6144, %s47_s18, [#allocation6], %s2135_s10, %s2135_s10, %s2136_s11  }
  0x23   :  { %s2093_s0 = scalar_lea.vmem %s59_s20, 6144  ;;  %p2098_p2 = scmp.lt.s32.totalorder %s59_s20, %s59_s20 }
  0x24   :  { %p2094_p1 = scmp.ne.s32.totalorder %s59_s20, %s2093_s0  ;;  %p2099_p3 = scmp.lt.s32.totalorder %s2093_s0, %s2093_s0 }
  0x26   :  { %p2100_p4 = por %p2099_p3, %p2098_p2 }
  0x28   :  { %p2101_p5 = pnand %p2100_p4, %p2094_p1 }
  0x2a   :  { %2104 = shalt.err (!%p2101_p5)
}
  0x2b   :  { %64 = dma.hbm_to_vmem [thread:$0]  %s2514_s3, 6144, %s59_s20, [#allocation9], %s2135_s10, %s2135_s10, %s2136_s11  }
  0x2c   :  { %2125 = dma.done.wait [#allocation3], 512  }
  0x2d   :  { %2126 = vsyncadd [#allocation3], 4294966784 }
  0x2e   :  { %2127 = dma.done.wait [#allocation6], 7680  }
  0x2f   :  { %2128 = vsyncadd [#allocation6], 4294959616 }
  0x30   :  { %2129 = dma.done.wait [#allocation9], 6144  }
  0x31   :  { %2130 = vsyncadd [#allocation9], 4294961152  ;;  %v2212_v0 = vld [vmem:[#allocation2 + $0x18] sm:$0xff]  ;;  %v2214_v1 = vld [vmem:[#allocation2 + $0x10] sm:$0xff]  ;;  %vm103_vm0 = vcmask 261120   ;;  %s2139_s2 = smov 16  }
  0x32   :  { %1807 = vmatprep.subr.mxu0 %v2212_v0  ;;  %1821 = vmatprep.subr.mxu1 %v2212_v0  ;;  %v2220_v2 = vld [vmem:[#allocation2 + $0x8] sm:$0xff]  ;;  %v2226_v3 = vld [vmem:[#allocation2] sm:$0xff]  ;;  %v2241_v7 = vld [vmem:[#allocation5 + $0x10] sm:$0xff]  ;;  %s2140_s3 = smov 32   ;;  %s2141_s25 = smov 64  }
  0x33   :  { %1808 = vmatpush3.msra.mxu0 %v2212_v0  ;;  %1822 = vmatpush3.msra.mxu1 %v2212_v0  ;;  %v2228_v4 = vld [vmem:[#allocation5] sm:$0xff]  ;;  %v2234_v5 = vld [vmem:[#allocation5 + $0x8] sm:$0xff]  ;;  %v329_v9 = vld [vmem:[#allocation7 + $0xf8] sm:$0xff] }
  0x34   :  { %1809 = vmatprep.subr.mxu0 %v2214_v1  ;;  %1823 = vmatprep.subr.mxu1 %v2214_v1  ;;  %v2239_v6 = vld [vmem:[#allocation5 + $0x20] sm:$0xff]  ;;  %v2245_v8 = vld [vmem:[#allocation5 + $0x28] sm:$0xff]  ;;  %v2250_v10 = vld [vmem:[#allocation5 + $0x30] sm:$0xff] }
  0x35   :  { %1810 = vmatpush3.msra.mxu0 %v2214_v1  ;;  %1824 = vmatpush3.msra.mxu1 %v2214_v1  ;;  %v313_v11 = vld [vmem:[#allocation7 + $0x78] sm:$0xff]  ;;  %v328_v13 = vld [vmem:[#allocation7 + $0xf0] sm:$0xff]  ;;  %v327_v17 = vld [vmem:[#allocation7 + $0xe8] sm:$0xff] }
  0x36   :  { %1811 = vmatprep.subr.mxu0 %v2220_v2  ;;  %1825 = vmatprep.subr.mxu1 %v2220_v2  ;;  %v2256_v12 = vld [vmem:[#allocation5 + $0x18] sm:$0xff]  ;;  %v312_v15 = vld [vmem:[#allocation7 + $0x70] sm:$0xff]  ;;  %v311_v18 = vld [vmem:[#allocation7 + $0x68] sm:$0xff] }
  0x37   :  { %1812 = vmatpush3.msra.mxu0 %v2220_v2  ;;  %1826 = vmatpush3.msra.mxu1 %v2220_v2  ;;  %v345_v14 = vld [vmem:[#allocation7 + $0x178] sm:$0xff]  ;;  %v344_v19 = vld [vmem:[#allocation7 + $0x170] sm:$0xff]  ;;  %v326_v20 = vld [vmem:[#allocation7 + $0xe0] sm:$0xff] }
  0x38   :  { %1813 = vmatprep.subr.mxu0 %v2226_v3  ;;  %1815 = vmatprep.mubr.msk.f32.mxu0 %vm103_vm0, %v2228_v4  ;;  %v2262_v16 = vld [vmem:[#allocation5 + $0x38] sm:$0xff]  ;;  %v310_v21 = vld [vmem:[#allocation7 + $0x60] sm:$0xff]  ;;  %v343_v22 = vld [vmem:[#allocation7 + $0x168] sm:$0xff] }
  0x39   :  { %1814 = vmatpush3.msra.mxu0 %v2226_v3  ;;  %1827 = vmatprep.subr.mxu1 %v2226_v3  ;;  %v325_v23 = vld [vmem:[#allocation7 + $0xd8] sm:$0xff]  ;;  %v342_v25 = vld [vmem:[#allocation7 + $0x160] sm:$0xff]  ;;  %v324_v26 = vld [vmem:[#allocation7 + $0xd0] sm:$0xff] }
  0x3a   :  { %1816 = vmatmul.mubr.msk.f32.vlgmr.msra.gmra.mxu0 %vm103_vm0, %v2234_v5  ;;  %1828 = vmatpush3.msra.mxu1 %v2226_v3  ;;  %v309_v24 = vld [vmem:[#allocation7 + $0x58] sm:$0xff]  ;;  %v308_v27 = vld [vmem:[#allocation7 + $0x50] sm:$0xff]  ;;  %v323_v29 = vld [vmem:[#allocation7 + $0xc8] sm:$0xff] }
  0x3b   :  { %1829 = vmatprep.mubr.msk.f32.mxu1 %vm103_vm0, %v2239_v6  ;;  %1818 = vmatprep.mubr.msk.f32.mxu0 %vm103_vm0, %v2241_v7  ;;  %v341_v28 = vld [vmem:[#allocation7 + $0x158] sm:$0xff]  ;;  %v307_v30 = vld [vmem:[#allocation7 + $0x48] sm:$0xff]  ;;  %v340_v31 = vld [vmem:[#allocation7 + $0x150] sm:$0xff] }
  0x3c   :  { %1830 = vmatmul.mubr.msk.f32.vlgmr.msra.gmra.mxu1 %vm103_vm0, %v2245_v8  ;;  %1631 = vmatprep.subr.mxu0 %v329_v9  ;;  %v322_v32 = vld [vmem:[#allocation7 + $0xc0] sm:$0xff]  ;;  %v339_v34 = vld [vmem:[#allocation7 + $0x148] sm:$0xff]  ;;  %v321_v35 = vld [vmem:[#allocation7 + $0xb8] sm:$0xff] }
  0x3d   :  { %1832 = vmatprep.mubr.msk.f32.mxu1 %vm103_vm0, %v2250_v10  ;;  %1632 = vmatpush3.msra.mxu0 %v313_v11  ;;  %v306_v33 = vld [vmem:[#allocation7 + $0x40] sm:$0xff]  ;;  %v305_v36 = vld [vmem:[#allocation7 + $0x38] sm:$0xff]  ;;  %v320_v38 = vld [vmem:[#allocation7 + $0xb0] sm:$0xff] }
  0x3e   :  { %1819 = vmatmul.mubr.msk.f32.gmra.mxu0 %vm103_vm0, %v2256_v12  ;;  %1633 = vmatprep.subr.mxu0 %v328_v13  ;;  %v338_v37 = vld [vmem:[#allocation7 + $0x140] sm:$0xff]  ;;  %v304_v39 = vld [vmem:[#allocation7 + $0x30] sm:$0xff]  ;;  %v337_v40 = vld [vmem:[#allocation7 + $0x138] sm:$0xff] }
  0x3f   :  { %1835 = vmatprep.subr.mxu1 %v345_v14  ;;  %1634 = vmatpush3.msra.mxu0 %v312_v15  ;;  %v319_v41 = vld [vmem:[#allocation7 + $0xa8] sm:$0xff]  ;;  %v336_v43 = vld [vmem:[#allocation7 + $0x130] sm:$0xff]  ;;  %v318_v44 = vld [vmem:[#allocation7 + $0xa0] sm:$0xff] }
  0x40   :  { %1833 = vmatmul.mubr.msk.f32.gmra.mxu1 %vm103_vm0, %v2262_v16  ;;  %1635 = vmatprep.subr.mxu0 %v327_v17  ;;  %v303_v42 = vld [vmem:[#allocation7 + $0x28] sm:$0xff]  ;;  %v302_v45 = vld [vmem:[#allocation7 + $0x20] sm:$0xff]  ;;  %v317_v47 = vld [vmem:[#allocation7 + $0x98] sm:$0xff] }
  0x41   :  { %1836 = vmatpush3.msra.mxu1 %v345_v14  ;;  %1636 = vmatpush3.msra.mxu0 %v311_v18  ;;  %v335_v46 = vld [vmem:[#allocation7 + $0x128] sm:$0xff]  ;;  %v301_v48 = vld [vmem:[#allocation7 + $0x18] sm:$0xff]  ;;  %v334_v49 = vld [vmem:[#allocation7 + $0x120] sm:$0xff] }
  0x42   :  { %1837 = vmatprep.subr.mxu1 %v344_v19  ;;  %1637 = vmatprep.subr.mxu0 %v326_v20  ;;  %v316_v50 = vld [vmem:[#allocation7 + $0x90] sm:$0xff]  ;;  %v333_v52 = vld [vmem:[#allocation7 + $0x118] sm:$0xff]  ;;  %v315_v53 = vld [vmem:[#allocation7 + $0x88] sm:$0xff] }
  0x43   :  { %1838 = vmatpush3.msra.mxu1 %v344_v19  ;;  %1638 = vmatpush3.msra.mxu0 %v310_v21  ;;  %v300_v51 = vld [vmem:[#allocation7 + $0x10] sm:$0xff]  ;;  %v299_v55 = vld [vmem:[#allocation7 + $0x8] sm:$0xff]  ;;  %v314_v56 = vld [vmem:[#allocation7 + $0x80] sm:$0xff] }
  0x44   :  { %1839 = vmatprep.subr.mxu1 %v343_v22  ;;  %1639 = vmatprep.subr.mxu0 %v325_v23  ;;  %v332_v54 = vld [vmem:[#allocation7 + $0x110] sm:$0xff]  ;;  %v331_v57 = vld [vmem:[#allocation7 + $0x108] sm:$0xff]  ;;  %v298_v58 = vld [vmem:[#allocation7] sm:$0xff] }
  0x45   :  { %1840 = vmatpush3.msra.mxu1 %v343_v22  ;;  %1640 = vmatpush3.msra.mxu0 %v309_v24  ;;  %v330_v59 = vld [vmem:[#allocation7 + $0x100] sm:$0xff] }
  0x46   :  { %1841 = vmatprep.subr.mxu1 %v342_v25  ;;  %1641 = vmatprep.subr.mxu0 %v324_v26  ;;  %v2272_v14 = vld [vmem:[#allocation5 + $0x40] sm:$0xff] }
  0x47   :  { %1842 = vmatpush3.msra.mxu1 %v342_v25  ;;  %1642 = vmatpush3.msra.mxu0 %v308_v27 }
  0x48   :  { %1843 = vmatprep.subr.mxu1 %v341_v28  ;;  %1643 = vmatprep.subr.mxu0 %v323_v29 }
  0x49   :  { %1844 = vmatpush3.msra.mxu1 %v341_v28  ;;  %1644 = vmatpush3.msra.mxu0 %v307_v30 }
  0x4a   :  { %1845 = vmatprep.subr.mxu1 %v340_v31  ;;  %1645 = vmatprep.subr.mxu0 %v322_v32 }
  0x4b   :  { %1846 = vmatpush3.msra.mxu1 %v340_v31  ;;  %1646 = vmatpush3.msra.mxu0 %v306_v33  ;;  %v2292_v33 = vld [vmem:[#allocation5 + $0x48] sm:$0xff] }
  0x4c   :  { %1847 = vmatprep.subr.mxu1 %v339_v34  ;;  %1647 = vmatprep.subr.mxu0 %v321_v35  ;;  %v2302_v35 = vld [vmem:[#allocation5 + $0x58] sm:$0xff] }
  0x4d   :  { %1848 = vmatpush3.msra.mxu1 %v339_v34  ;;  %1648 = vmatpush3.msra.mxu0 %v305_v36  ;;  %v2295_v34 = vld [vmem:[#allocation5 + $0x50] sm:$0xff] }
  0x4e   :  { %1849 = vmatprep.subr.mxu1 %v338_v37  ;;  %1649 = vmatprep.subr.mxu0 %v320_v38 }
  0x4f   :  { %1850 = vmatpush3.msra.mxu1 %v338_v37  ;;  %1650 = vmatpush3.msra.mxu0 %v304_v39 }
  0x50   :  { %1851 = vmatprep.subr.mxu1 %v337_v40  ;;  %1651 = vmatprep.subr.mxu0 %v319_v41 }
  0x51   :  { %1852 = vmatpush3.msra.mxu1 %v337_v40  ;;  %1652 = vmatpush3.msra.mxu0 %v303_v42 }
  0x52   :  { %1853 = vmatprep.subr.mxu1 %v336_v43  ;;  %1653 = vmatprep.subr.mxu0 %v318_v44 }
  0x53   :  { %1854 = vmatpush3.msra.mxu1 %v336_v43  ;;  %1654 = vmatpush3.msra.mxu0 %v302_v45 }
  0x54   :  { %1855 = vmatprep.subr.mxu1 %v335_v46  ;;  %1655 = vmatprep.subr.mxu0 %v317_v47 }
  0x55   :  { %1856 = vmatpush3.msra.mxu1 %v335_v46  ;;  %1656 = vmatpush3.msra.mxu0 %v301_v48 }
  0x56   :  { %1857 = vmatprep.subr.mxu1 %v334_v49  ;;  %1657 = vmatprep.subr.mxu0 %v316_v50 }
  0x57   :  { %1858 = vmatpush3.msra.mxu1 %v334_v49  ;;  %1658 = vmatpush3.msra.mxu0 %v300_v51 }
  0x58   :  { %1859 = vmatprep.subr.mxu1 %v333_v52  ;;  %1659 = vmatprep.subr.mxu0 %v315_v53 }
  0x59   :  { %1860 = vmatpush3.msra.mxu1 %v333_v52  ;;  %410 = vmatprep.mubr.f32.mxu0 %v2226_v3 }
  0x5a   :  { %1861 = vmatprep.subr.mxu1 %v332_v54  ;;  %1660 = vmatpush3.msra.mxu0 %v299_v55 }
  0x5b   :  { %1862 = vmatpush3.msra.mxu1 %v332_v54  ;;  %1661 = vmatprep.subr.mxu0 %v314_v56 }
  0x5c   :  { %1863 = vmatprep.subr.mxu1 %v331_v57  ;;  %1662 = vmatpush3.msra.mxu0 %v298_v58 }
  0x5d   :  { %1864 = vmatpush3.msra.mxu1 %v331_v57 }
  0x5e   :  { %1865 = vmatprep.subr.mxu1 %v330_v59 }
  0x5f   :  { %1866 = vmatpush3.msra.mxu1 %v330_v59 }
  0xfa   :  { %v1817_v60 = vpop.f32.mrf.mxu0 }
  0xfc   :  { %v1831_v61 = vpop.f32.mrf.mxu1  ;;  %v182_v62 = vpop.f32.mrf.mxu0 }
  0xfd   :  { %411 = vmatmul.mubr.f32.vlgmr.msra.gmra.mxu0 %v182_v62 }
  0xfe   :  { %v279_v63 = vpop.f32.mrf.mxu1  ;;  %415 = vmatprep.mubr.f32.mxu0 %v2220_v2  ;;  %v1820_v3 = vpop.f32.mrf.mxu0 }
  0xff   :  { %1867 = vmatprep.mubr.f32.mxu1 %v279_v63 }
 0x100   :  { %1868 = vmatmul.mubr.f32.vlgmr.msra.gmra.mxu1 %v1831_v61  ;;  %v1834_v9 = vpop.f32.mrf.mxu1  ;;  %v192_v13 = vpop.f32.mrf.mxu0 }
 0x101   :  { %416 = vmatmul.mubr.f32.gmra.mxu0 %v1817_v60 }
 0x102   :  { %420 = vmatprep.mubr.f32.mxu0 %v2214_v1  ;;  %v289_v11 = vpop.f32.mrf.mxu1 }
 0x103   :  { %1870 = vmatprep.mubr.f32.mxu1 %v289_v11 }
 0x104   :  { %1871 = vmatmul.mubr.f32.gmra.mxu1 %v1834_v9 }
 0x105   :  { %421 = vmatmul.mubr.f32.gmra.mxu0 %v192_v13  ;;  %1881 = vmatprep.mubr.msk.f32.mxu1 %vm103_vm0, %v2272_v14 }
 0x106   :  { %425 = vmatprep.mubr.f32.mxu0 %v2212_v0 }
 0x109   :  { %426 = vmatmul.mubr.f32.gmra.mxu0 %v1820_v3 }
 0x10a   :  { %1895 = vmatprep.mubr.msk.f32.mxu0 %vm103_vm0, %v2272_v14 }
 0x1bd   :  { %v1663_v2 = vpop.f32.mrf.mxu0 }
 0x1bf   :  { %v1664_v15 = vpop.f32.mrf.mxu0 }
 0x1c0   :  { %v1869_v1 = vpop.f32.mrf.mxu1  ;;  %v1665_v29 = vadd.f32 %v1664_v15, %v1663_v2 }
 0x1c1   :  { %v1666_v17 = vpop.f32.mrf.mxu0 }
 0x1c2   :  { %v497_v20 = vpop.f32.mrf.mxu1 }
 0x1c3   :  { %v1667_v18 = vpop.f32.mrf.mxu0  ;;  %v2288_v32 = vadd.f32 %v1665_v29, %v497_v20 }
 0x1c4   :  { %v1872_v22 = vpop.f32.mrf.mxu1  ;;  %v1668_v27 = vadd.f32 %v1667_v18, %v1666_v17 }
 0x1c5   :  { %v1669_v19 = vpop.f32.mrf.mxu0 }
 0x1c6   :  { %v507_v26 = vpop.f32.mrf.mxu1  ;;  %v2284_v31 = vadd.f32 %v1869_v1, %v1668_v27 }
 0x1c7   :  { %v1670_v21 = vpop.f32.mrf.mxu0 }
 0x1c8   :  { %v1671_v24 = vadd.f32 %v1670_v21, %v1669_v19 }
 0x1c9   :  { %v1672_v23 = vpop.f32.mrf.mxu0 }
 0x1ca   :  { %v2280_v30 = vadd.f32 %v1671_v24, %v507_v26 }
 0x1cb   :  { %v1673_v0 = vpop.f32.mrf.mxu0 }
 0x1cc   :  { %v1674_v25 = vadd.f32 %v1673_v0, %v1672_v23 }
 0x1ce   :  { %v2278_v28 = vadd.f32 %v1872_v22, %v1674_v25 }
 0x1d0   :  { %1873 = vmatprep.subr.mxu1 %v2278_v28 }
 0x1d1   :  { %1874 = vmatpush3.msra.mxu1 %v2278_v28 }
 0x1d2   :  { %1875 = vmatprep.subr.mxu1 %v2280_v30 }
 0x1d3   :  { %1876 = vmatpush3.msra.mxu1 %v2280_v30 }
 0x1d4   :  { %1877 = vmatprep.subr.mxu1 %v2284_v31 }
 0x1d5   :  { %1878 = vmatpush3.msra.mxu1 %v2284_v31 }
 0x1d6   :  { %1879 = vmatprep.subr.mxu1 %v2288_v32 }
 0x1d7   :  { %1880 = vmatpush3.msra.mxu1 %v2288_v32 }
 0x1d8   :  { %1882 = vmatmul.mubr.msk.f32.vlgmr.msra.gmra.mxu1 %vm103_vm0, %v2292_v33 }
 0x1d9   :  { %1884 = vmatprep.mubr.msk.f32.mxu1 %vm103_vm0, %v2295_v34 }
 0x1dc   :  { %1885 = vmatmul.mubr.msk.f32.gmra.mxu1 %vm103_vm0, %v2302_v35 }
 0x1dd   :  { %1909 = vmatprep.mubr.msk.f32.mxu1 %vm103_vm0, %v2228_v4 }
 0x298   :  { %v1883_v36 = vpop.f32.mrf.mxu1 }
 0x299   :  { %617 = vrot.lane.b32.xlu1 %v1883_v36, %s2136_s11 }
 0x29a   :  { %v596_v37 = vpop.f32.mrf.mxu1 }
 0x29c   :  { %v1886_v38 = vpop.f32.mrf.mxu1 }
 0x29d   :  { %615 = vrot.lane.b32.xlu1 %v596_v37, %s2136_s11  ;;  %621 = vrot.lane.b32.xlu0 %v1886_v38, %s2136_s11 }
 0x29e   :  { %v606_v39 = vpop.f32.mrf.mxu1 }
 0x2a1   :  { %619 = vrot.lane.b32.xlu0 %v606_v39, %s2136_s11 }
 0x30b   :  { %v618_v40 = vpop.permute.xlu1 %617 }
 0x30c   :  { %v624_v4 = vadd.f32 %v1883_v36, %v618_v40 }
 0x30f   :  { %v622_v41 = vpop.permute.xlu0 %621  ;;  %v616_v45 = vpop.permute.xlu1 %615 }
 0x310   :  { %v626_v42 = vadd.f32 %v1886_v38, %v622_v41  ;;  %v623_v46 = vadd.f32 %v616_v45, %v596_v37 }
 0x312   :  { %633 = vrot.lane.b32.xlu0 %v626_v42, %s2139_s2 }
 0x313   :  { %v620_v43 = vpop.permute.xlu0 %619 }
 0x314   :  { %v625_v44 = vadd.f32 %v620_v43, %v606_v39 }
 0x316   :  { %629 = vrot.lane.b32.xlu0 %v624_v4, %s2139_s2  ;;  %631 = vrot.lane.b32.xlu1 %v625_v44, %s2139_s2 }
 0x31a   :  { %627 = vrot.lane.b32.xlu1 %v623_v46, %s2139_s2 }
 0x384   :  { %v634_v47 = vpop.permute.xlu0 %633 }
 0x385   :  { %v638_v48 = vadd.f32 %v634_v47, %v626_v42 }
 0x387   :  { %645 = vrot.lane.b32.xlu0 %v638_v48, %s2140_s3 }
 0x388   :  { %v632_v49 = vpop.permute.xlu1 %631  ;;  %v630_v50 = vpop.permute.xlu0 %629 }
 0x389   :  { %v637_v51 = vadd.f32 %v632_v49, %v625_v44  ;;  %v636_v52 = vadd.f32 %v630_v50, %v624_v4 }
 0x38b   :  { %643 = vrot.lane.b32.xlu1 %v637_v51, %s2140_s3  ;;  %641 = vrot.lane.b32.xlu0 %v636_v52, %s2140_s3 }
 0x38c   :  { %v628_v53 = vpop.permute.xlu1 %627 }
 0x38d   :  { %v635_v54 = vadd.f32 %v628_v53, %v623_v46 }
 0x38f   :  { %639 = vrot.lane.b32.xlu1 %v635_v54, %s2140_s3 }
 0x3f9   :  { %v646_v55 = vpop.permute.xlu0 %645 }
 0x3fa   :  { %v650_v56 = vadd.f32 %v646_v55, %v638_v48 }
 0x3fc   :  { %657 = vrot.lane.b32.xlu0 %v650_v56, %s2141_s25 }
 0x3fd   :  { %v644_v57 = vpop.permute.xlu1 %643  ;;  %v642_v58 = vpop.permute.xlu0 %641 }
 0x3fe   :  { %v649_v59 = vadd.f32 %v644_v57, %v637_v51  ;;  %v648_v60 = vadd.f32 %v642_v58, %v636_v52 }
 0x400   :  { %655 = vrot.lane.b32.xlu1 %v649_v59, %s2141_s25  ;;  %653 = vrot.lane.b32.xlu0 %v648_v60, %s2141_s25 }
 0x401   :  { %v640_v61 = vpop.permute.xlu1 %639 }
 0x402   :  { %v647_v62 = vadd.f32 %v640_v61, %v635_v54 }
 0x404   :  { %651 = vrot.lane.b32.xlu1 %v647_v62, %s2141_s25 }
 0x46e   :  { %v658_v63 = vpop.permute.xlu0 %657 }
 0x46f   :  { %v662_v3 = vadd.f32 %v658_v63, %v650_v56 }
 0x471   :  { %v666_v9 = vmul.f32 0.00390625, %v662_v3 }
 0x472   :  { %v656_v11 = vpop.permute.xlu1 %655  ;;  %v654_v13 = vpop.permute.xlu0 %653 }
 0x473   :  { %v2325_v2 = vsub.f32 %v2278_v28, %v666_v9  ;;  %v661_v15 = vadd.f32 %v656_v11, %v649_v59  ;;  %v660_v17 = vadd.f32 %v654_v13, %v648_v60 }
 0x475   :  { %v665_v1 = vmul.f32 0.00390625, %v661_v15  ;;  %v664_v18 = vmul.f32 0.00390625, %v660_v17  ;;  %v674_v19 = vmul.f32 %v2325_v2, %v2325_v2 }
 0x476   :  { %v652_v20 = vpop.permute.xlu1 %651 }
 0x477   :  { %v2330_v21 = vsub.f32 %v2280_v30, %v665_v1  ;;  %v2333_v22 = vsub.f32 %v2284_v31, %v664_v18  ;;  %v659_v23 = vadd.f32 %v652_v20, %v647_v62  ;;  %1887 = vmatprep.subr.mxu0 %v674_v19  ;;  %v1595_v20 = vld [vmem:[%s2515_s4] ss:$0 sm:$0xff] }
 0x478   :  { %1888 = vmatpush3.msra.mxu0 %v674_v19 }
 0x479   :  { %v663_v0 = vmul.f32 0.00390625, %v659_v23  ;;  %v673_v24 = vmul.f32 %v2330_v21, %v2330_v21  ;;  %v672_v26 = vmul.f32 %v2333_v22, %v2333_v22 }
 0x47b   :  { %v2338_v25 = vsub.f32 %v2288_v32, %v663_v0  ;;  %1889 = vmatprep.subr.mxu0 %v673_v24 }
 0x47c   :  { %1890 = vmatpush3.msra.mxu0 %v673_v24 }
 0x47d   :  { %1891 = vmatprep.subr.mxu0 %v672_v26  ;;  %v671_v27 = vmul.f32 %v2338_v25, %v2338_v25 }
 0x47e   :  { %1892 = vmatpush3.msra.mxu0 %v672_v26  ;;  %v1596_v26 = vld [vmem:[%s2516_s5] ss:$0 sm:$0xff] }
 0x47f   :  { %1893 = vmatprep.subr.mxu0 %v671_v27 }
 0x480   :  { %1894 = vmatpush3.msra.mxu0 %v671_v27 }
 0x481   :  { %1896 = vmatmul.mubr.msk.f32.vlgmr.msra.gmra.mxu0 %vm103_vm0, %v2292_v33 }
 0x482   :  { %1898 = vmatprep.mubr.msk.f32.mxu0 %vm103_vm0, %v2295_v34 }
 0x485   :  { %1899 = vmatmul.mubr.msk.f32.gmra.mxu0 %vm103_vm0, %v2302_v35 }
 0x486   :  { %1923 = vmatprep.mubr.msk.f32.mxu0 %vm103_vm0, %v2239_v6 }
 0x541   :  { %v1897_v28 = vpop.f32.mrf.mxu0 }
 0x543   :  { %v741_v29 = vpop.f32.mrf.mxu0 }
 0x545   :  { %v1900_v30 = vpop.f32.mrf.mxu0 }
 0x546   :  { %766 = vrot.lane.b32.xlu0 %v1900_v30, %s2136_s11 }
 0x547   :  { %v751_v31 = vpop.f32.mrf.mxu0 }
 0x548   :  { %764 = vrot.lane.b32.xlu1 %v751_v31, %s2136_s11 }
 0x54a   :  { %762 = vrot.lane.b32.xlu0 %v1897_v28, %s2136_s11 }
 0x54c   :  { %760 = vrot.lane.b32.xlu1 %v741_v29, %s2136_s11 }
 0x5b8   :  { %v767_v32 = vpop.permute.xlu0 %766 }
 0x5b9   :  { %v771_v36 = vadd.f32 %v1900_v30, %v767_v32 }
 0x5ba   :  { %v765_v37 = vpop.permute.xlu1 %764 }
 0x5bb   :  { %v770_v38 = vadd.f32 %v765_v37, %v751_v31  ;;  %778 = vrot.lane.b32.xlu0 %v771_v36, %s2139_s2 }
 0x5bc   :  { %v763_v39 = vpop.permute.xlu0 %762 }
 0x5bd   :  { %v769_v6 = vadd.f32 %v1897_v28, %v763_v39  ;;  %776 = vrot.lane.b32.xlu1 %v770_v38, %s2139_s2 }
 0x5be   :  { %v761_v40 = vpop.permute.xlu1 %760 }
 0x5bf   :  { %v768_v41 = vadd.f32 %v761_v40, %v741_v29  ;;  %774 = vrot.lane.b32.xlu0 %v769_v6, %s2139_s2 }
 0x5c1   :  { %772 = vrot.lane.b32.xlu1 %v768_v41, %s2139_s2 }
 0x62d   :  { %v779_v42 = vpop.permute.xlu0 %778 }
 0x62e   :  { %v783_v43 = vadd.f32 %v779_v42, %v771_v36  ;;  %v1049_v42 = vld [vmem:[#allocation8 + $0xf8] sm:$0xff] }
 0x62f   :  { %v777_v4 = vpop.permute.xlu1 %776 }
 0x630   :  { %v782_v44 = vadd.f32 %v777_v4, %v770_v38  ;;  %790 = vrot.lane.b32.xlu0 %v783_v43, %s2140_s3  ;;  %v1033_v4 = vld [vmem:[#allocation8 + $0x78] sm:$0xff] }
 0x631   :  { %v775_v45 = vpop.permute.xlu0 %774 }
 0x632   :  { %v781_v46 = vadd.f32 %v775_v45, %v769_v6  ;;  %788 = vrot.lane.b32.xlu1 %v782_v44, %s2140_s3  ;;  %v1032_v45 = vld [vmem:[#allocation8 + $0x70] sm:$0xff] }
 0x633   :  { %v773_v47 = vpop.permute.xlu1 %772 }
 0x634   :  { %v780_v48 = vadd.f32 %v773_v47, %v768_v41  ;;  %786 = vrot.lane.b32.xlu0 %v781_v46, %s2140_s3  ;;  %v1030_v47 = vld [vmem:[#allocation8 + $0x60] sm:$0xff] }
 0x636   :  { %784 = vrot.lane.b32.xlu1 %v780_v48, %s2140_s3 }
 0x6a2   :  { %v791_v49 = vpop.permute.xlu0 %790 }
 0x6a3   :  { %v795_v50 = vadd.f32 %v791_v49, %v783_v43  ;;  %v1065_v43 = vld [vmem:[#allocation8 + $0x178] sm:$0xff] }
 0x6a4   :  { %v789_v51 = vpop.permute.xlu1 %788  ;;  %v1045_v49 = vld [vmem:[#allocation8 + $0xd8] sm:$0xff] }
 0x6a5   :  { %v794_v52 = vadd.f32 %v789_v51, %v782_v44  ;;  %802 = vrot.lane.b32.xlu0 %v795_v50, %s2141_s25  ;;  %v1048_v44 = vld [vmem:[#allocation8 + $0xf0] sm:$0xff] }
 0x6a6   :  { %v787_v53 = vpop.permute.xlu0 %786  ;;  %v1028_v51 = vld [vmem:[#allocation8 + $0x50] sm:$0xff] }
 0x6a7   :  { %v793_v54 = vadd.f32 %v787_v53, %v781_v46  ;;  %800 = vrot.lane.b32.xlu1 %v794_v52, %s2141_s25  ;;  %v1064_v46 = vld [vmem:[#allocation8 + $0x170] sm:$0xff]  ;;  %v1043_v53 = vld [vmem:[#allocation8 + $0xc8] sm:$0xff] }
 0x6a8   :  { %v785_v55 = vpop.permute.xlu1 %784 }
 0x6a9   :  { %v792_v56 = vadd.f32 %v785_v55, %v780_v48  ;;  %798 = vrot.lane.b32.xlu0 %v793_v54, %s2141_s25  ;;  %v1062_v48 = vld [vmem:[#allocation8 + $0x160] sm:$0xff]  ;;  %v1059_v55 = vld [vmem:[#allocation8 + $0x148] sm:$0xff] }
 0x6ab   :  { %796 = vrot.lane.b32.xlu1 %v792_v56, %s2141_s25 }
 0x717   :  { %v803_v57 = vpop.permute.xlu0 %802 }
 0x718   :  { %v807_v58 = vadd.f32 %v803_v57, %v795_v50  ;;  %v1061_v50 = vld [vmem:[#allocation8 + $0x158] sm:$0xff]  ;;  %v1026_v57 = vld [vmem:[#allocation8 + $0x40] sm:$0xff] }
 0x719   :  { %v801_v59 = vpop.permute.xlu1 %800 }
 0x71a   :  { %v811_v60 = vmul.f32 0.00390625, %v807_v58  ;;  %v806_v61 = vadd.f32 %v801_v59, %v794_v52  ;;  %v1060_v52 = vld [vmem:[#allocation8 + $0x150] sm:$0xff]  ;;  %v1058_v58 = vld [vmem:[#allocation8 + $0x140] sm:$0xff]  ;;  %v1041_v59 = vld [vmem:[#allocation8 + $0xb8] sm:$0xff] }
 0x71b   :  { %v799_v62 = vpop.permute.xlu0 %798 }
 0x71c   :  { %v815_v63 = vadd.f32 1e-05, %v811_v60  ;;  %v810_v3 = vmul.f32 0.00390625, %v806_v61  ;;  %v805_v9 = vadd.f32 %v799_v62, %v793_v54  ;;  %v1027_v54 = vld [vmem:[#allocation8 + $0x48] sm:$0xff]  ;;  %v1025_v60 = vld [vmem:[#allocation8 + $0x38] sm:$0xff]  ;;  %v1040_v62 = vld [vmem:[#allocation8 + $0xb0] sm:$0xff] }
 0x71d   :  { %v797_v11 = vpop.permute.xlu1 %796  ;;  %v1057_v61 = vld [vmem:[#allocation8 + $0x138] sm:$0xff] }
 0x71e   :  { %2005 = vrsqrt.f32 %v815_v63  ;;  %v814_v13 = vadd.f32 1e-05, %v810_v3  ;;  %v809_v15 = vmul.f32 0.00390625, %v805_v9  ;;  %v804_v17 = vadd.f32 %v797_v11, %v792_v56  ;;  %v1042_v56 = vld [vmem:[#allocation8 + $0xc0] sm:$0xff]  ;;  %v1024_v63 = vld [vmem:[#allocation8 + $0x30] sm:$0xff]  ;;  %v1039_v9 = vld [vmem:[#allocation8 + $0xa8] sm:$0xff] }
 0x71f   :  { %v1056_v3 = vld [vmem:[#allocation8 + $0x130] sm:$0xff]  ;;  %v1023_v11 = vld [vmem:[#allocation8 + $0x28] sm:$0xff] }
 0x720   :  { %2007 = vrsqrt.f32 %v814_v13  ;;  %v813_v1 = vadd.f32 1e-05, %v809_v15  ;;  %v808_v18 = vmul.f32 0.00390625, %v804_v17  ;;  %v1055_v13 = vld [vmem:[#allocation8 + $0x128] sm:$0xff]  ;;  %v1038_v15 = vld [vmem:[#allocation8 + $0xa0] sm:$0xff] }
 0x721   :  { %v1022_v17 = vld [vmem:[#allocation8 + $0x20] sm:$0xff] }
 0x722   :  { %2009 = vrsqrt.f32 %v813_v1  ;;  %v812_v19 = vadd.f32 1e-05, %v808_v18  ;;  %v1054_v1 = vld [vmem:[#allocation8 + $0x120] sm:$0xff]  ;;  %v1037_v18 = vld [vmem:[#allocation8 + $0x98] sm:$0xff] }
 0x724   :  { %2011 = vrsqrt.f32 %v812_v19  ;;  %v1021_v19 = vld [vmem:[#allocation8 + $0x18] sm:$0xff] }
 0x72b   :  { %v2006_v23 = vpop.eup %2005 }
 0x72c   :  { %v829_v0 = vmul.f32 %v2006_v23, %v1595_v20  ;;  %v1036_v23 = vld [vmem:[#allocation8 + $0x90] sm:$0xff] }
 0x72d   :  { %v2008_v24 = vpop.eup %2007 }
 0x72e   :  { %v828_v27 = vmul.f32 %v2008_v24, %v1595_v20  ;;  %v833_v28 = vmul.f32 %v829_v0, %v2325_v2  ;;  %v1020_v0 = vld [vmem:[#allocation8 + $0x10] sm:$0xff] }
 0x72f   :  { %v2010_v29 = vpop.eup %2009  ;;  %v1052_v24 = vld [vmem:[#allocation8 + $0x110] sm:$0xff] }
 0x730   :  { %v827_v30 = vmul.f32 %v2010_v29, %v1595_v20  ;;  %v843_v31 = vadd.f32 %v1596_v26, %v833_v28  ;;  %v832_v32 = vmul.f32 %v828_v27, %v2330_v21  ;;  %v1019_v27 = vld [vmem:[#allocation8 + $0x8] sm:$0xff]  ;;  %v1034_v28 = vld [vmem:[#allocation8 + $0x80] sm:$0xff] }
 0x731   :  { %v2012_v36 = vpop.eup %2011  ;;  %v1051_v29 = vld [vmem:[#allocation8 + $0x108] sm:$0xff] }
 0x732   :  { %v826_v37 = vmul.f32 %v2012_v36, %v1595_v20  ;;  %v2376_v38 = vmax.f32 %v843_v31, 0.0  ;;  %v842_v39 = vadd.f32 %v1596_v26, %v832_v32  ;;  %v831_v6 = vmul.f32 %v827_v30, %v2333_v22  ;;  %v1053_v20 = vld [vmem:[#allocation8 + $0x118] sm:$0xff]  ;;  %v1018_v30 = vld [vmem:[#allocation8] sm:$0xff] }
 0x733   :  { %v1050_v31 = vld [vmem:[#allocation8 + $0x100] sm:$0xff] }
 0x734   :  { %1901 = vmatprep.subr.mxu1 %v2376_v38  ;;  %1915 = vmatprep.subr.mxu0 %v2376_v38  ;;  %v2381_v40 = vmax.f32 %v842_v39, 0.0  ;;  %v841_v41 = vadd.f32 %v1596_v26, %v831_v6  ;;  %v830_v2 = vmul.f32 %v826_v37, %v2338_v25 }
 0x735   :  { %1902 = vmatpush3.msra.mxu1 %v2376_v38  ;;  %1916 = vmatpush3.msra.mxu0 %v2376_v38 }
 0x736   :  { %1903 = vmatprep.subr.mxu1 %v2381_v40  ;;  %1917 = vmatprep.subr.mxu0 %v2381_v40  ;;  %v2388_v21 = vmax.f32 %v841_v41, 0.0  ;;  %v840_v22 = vadd.f32 %v1596_v26, %v830_v2  ;;  %v1035_v26 = vld [vmem:[#allocation8 + $0x88] sm:$0xff] }
 0x737   :  { %1904 = vmatpush3.msra.mxu1 %v2381_v40  ;;  %1918 = vmatpush3.msra.mxu0 %v2381_v40 }
 0x738   :  { %1905 = vmatprep.subr.mxu1 %v2388_v21  ;;  %1919 = vmatprep.subr.mxu0 %v2388_v21  ;;  %v844_v25 = vmax.f32 %v840_v22, 0.0 }
 0x739   :  { %1906 = vmatpush3.msra.mxu1 %v2388_v21  ;;  %1920 = vmatpush3.msra.mxu0 %v2388_v21 }
 0x73a   :  { %1907 = vmatprep.subr.mxu1 %v844_v25  ;;  %1921 = vmatprep.subr.mxu0 %v844_v25 }
 0x73b   :  { %1908 = vmatpush3.msra.mxu1 %v844_v25  ;;  %1922 = vmatpush3.msra.mxu0 %v844_v25 }
 0x73c   :  { %1910 = vmatmul.mubr.msk.f32.vlgmr.msra.gmra.mxu1 %vm103_vm0, %v2234_v5  ;;  %1924 = vmatmul.mubr.msk.f32.vlgmr.msra.gmra.mxu0 %vm103_vm0, %v2245_v8  ;;  %v1047_v5 = vld [vmem:[#allocation8 + $0xe8] sm:$0xff] }
 0x73d   :  { %1912 = vmatprep.mubr.msk.f32.mxu1 %vm103_vm0, %v2241_v7  ;;  %1926 = vmatprep.mubr.msk.f32.mxu0 %vm103_vm0, %v2250_v10  ;;  %v1031_v7 = vld [vmem:[#allocation8 + $0x68] sm:$0xff]  ;;  %v1046_v10 = vld [vmem:[#allocation8 + $0xe0] sm:$0xff] }
 0x73e   :  { %1727 = vmatprep.subr.mxu1 %v1049_v42  ;;  %1929 = vmatprep.subr.mxu0 %v1065_v43  ;;  %v1063_v8 = vld [vmem:[#allocation8 + $0x168] sm:$0xff] }
 0x73f   :  { %1728 = vmatpush3.msra.mxu1 %v1033_v4  ;;  %1930 = vmatpush3.msra.mxu0 %v1065_v43 }
 0x740   :  { %1913 = vmatmul.mubr.msk.f32.gmra.mxu1 %vm103_vm0, %v2256_v12  ;;  %1927 = vmatmul.mubr.msk.f32.gmra.mxu0 %vm103_vm0, %v2262_v16  ;;  %v1029_v12 = vld [vmem:[#allocation8 + $0x58] sm:$0xff]  ;;  %v1044_v16 = vld [vmem:[#allocation8 + $0xd0] sm:$0xff] }
 0x741   :  { %1130 = vmatprep.mubr.f32.mxu1 %v844_v25  ;;  %1729 = vmatprep.subr.mxu1 %v1048_v44 }
 0x742   :  { %1730 = vmatpush3.msra.mxu1 %v1032_v45  ;;  %1931 = vmatprep.subr.mxu0 %v1064_v46 }
 0x743   :  { %1731 = vmatprep.subr.mxu1 %v1047_v5  ;;  %1932 = vmatpush3.msra.mxu0 %v1064_v46 }
 0x744   :  { %1732 = vmatpush3.msra.mxu1 %v1031_v7  ;;  %1933 = vmatprep.subr.mxu0 %v1063_v8 }
 0x745   :  { %1733 = vmatprep.subr.mxu1 %v1046_v10  ;;  %1934 = vmatpush3.msra.mxu0 %v1063_v8 }
 0x746   :  { %1734 = vmatpush3.msra.mxu1 %v1030_v47  ;;  %1935 = vmatprep.subr.mxu0 %v1062_v48 }
 0x747   :  { %1735 = vmatprep.subr.mxu1 %v1045_v49  ;;  %1936 = vmatpush3.msra.mxu0 %v1062_v48 }
 0x748   :  { %1736 = vmatpush3.msra.mxu1 %v1029_v12  ;;  %1937 = vmatprep.subr.mxu0 %v1061_v50 }
 0x749   :  { %1737 = vmatprep.subr.mxu1 %v1044_v16  ;;  %1938 = vmatpush3.msra.mxu0 %v1061_v50 }
 0x74a   :  { %1738 = vmatpush3.msra.mxu1 %v1028_v51  ;;  %1939 = vmatprep.subr.mxu0 %v1060_v52 }
 0x74b   :  { %1739 = vmatprep.subr.mxu1 %v1043_v53  ;;  %1940 = vmatpush3.msra.mxu0 %v1060_v52 }
 0x74c   :  { %1740 = vmatpush3.msra.mxu1 %v1027_v54  ;;  %1941 = vmatprep.subr.mxu0 %v1059_v55 }
 0x74d   :  { %1741 = vmatprep.subr.mxu1 %v1042_v56  ;;  %1942 = vmatpush3.msra.mxu0 %v1059_v55 }
 0x74e   :  { %1742 = vmatpush3.msra.mxu1 %v1026_v57  ;;  %1943 = vmatprep.subr.mxu0 %v1058_v58 }
 0x74f   :  { %1743 = vmatprep.subr.mxu1 %v1041_v59  ;;  %1944 = vmatpush3.msra.mxu0 %v1058_v58 }
 0x750   :  { %1744 = vmatpush3.msra.mxu1 %v1025_v60  ;;  %1945 = vmatprep.subr.mxu0 %v1057_v61 }
 0x751   :  { %1745 = vmatprep.subr.mxu1 %v1040_v62  ;;  %1946 = vmatpush3.msra.mxu0 %v1057_v61 }
 0x752   :  { %1746 = vmatpush3.msra.mxu1 %v1024_v63  ;;  %1947 = vmatprep.subr.mxu0 %v1056_v3 }
 0x753   :  { %1747 = vmatprep.subr.mxu1 %v1039_v9  ;;  %1948 = vmatpush3.msra.mxu0 %v1056_v3 }
 0x754   :  { %1748 = vmatpush3.msra.mxu1 %v1023_v11  ;;  %1949 = vmatprep.subr.mxu0 %v1055_v13 }
 0x755   :  { %1749 = vmatprep.subr.mxu1 %v1038_v15  ;;  %1950 = vmatpush3.msra.mxu0 %v1055_v13 }
 0x756   :  { %1750 = vmatpush3.msra.mxu1 %v1022_v17  ;;  %1951 = vmatprep.subr.mxu0 %v1054_v1 }
 0x757   :  { %1751 = vmatprep.subr.mxu1 %v1037_v18  ;;  %1952 = vmatpush3.msra.mxu0 %v1054_v1 }
 0x758   :  { %1752 = vmatpush3.msra.mxu1 %v1021_v19  ;;  %1953 = vmatprep.subr.mxu0 %v1053_v20 }
 0x759   :  { %1753 = vmatprep.subr.mxu1 %v1036_v23  ;;  %1954 = vmatpush3.msra.mxu0 %v1053_v20 }
 0x75a   :  { %1754 = vmatpush3.msra.mxu1 %v1020_v0  ;;  %1955 = vmatprep.subr.mxu0 %v1052_v24 }
 0x75b   :  { %1755 = vmatprep.subr.mxu1 %v1035_v26  ;;  %1956 = vmatpush3.msra.mxu0 %v1052_v24 }
 0x75c   :  { %1756 = vmatpush3.msra.mxu1 %v1019_v27  ;;  %1957 = vmatprep.subr.mxu0 %v1051_v29 }
 0x75d   :  { %1757 = vmatprep.subr.mxu1 %v1034_v28  ;;  %1958 = vmatpush3.msra.mxu0 %v1051_v29 }
 0x75e   :  { %1758 = vmatpush3.msra.mxu1 %v1018_v30  ;;  %1959 = vmatprep.subr.mxu0 %v1050_v31 }
 0x75f   :  { %1960 = vmatpush3.msra.mxu0 %v1050_v31 }
 0x7fc   :  { %v1911_v32 = vpop.f32.mrf.mxu1  ;;  %v1925_v36 = vpop.f32.mrf.mxu0 }
 0x7fe   :  { %v914_v37 = vpop.f32.mrf.mxu1  ;;  %v999_v39 = vpop.f32.mrf.mxu0 }
 0x7ff   :  { %1131 = vmatmul.mubr.f32.vlgmr.msra.gmra.mxu1 %v914_v37  ;;  %1961 = vmatprep.mubr.f32.mxu0 %v999_v39 }
 0x800   :  { %1135 = vmatprep.mubr.f32.mxu1 %v2388_v21  ;;  %1962 = vmatmul.mubr.f32.vlgmr.msra.gmra.mxu0 %v1925_v36  ;;  %v1928_v6 = vpop.f32.mrf.mxu0  ;;  %v1914_v41 = vpop.f32.mrf.mxu1 }
 0x802   :  { %v1009_v2 = vpop.f32.mrf.mxu0  ;;  %v924_v22 = vpop.f32.mrf.mxu1 }
 0x803   :  { %1136 = vmatmul.mubr.f32.gmra.mxu1 %v1911_v32  ;;  %1964 = vmatprep.mubr.f32.mxu0 %v1009_v2 }
 0x804   :  { %1140 = vmatprep.mubr.f32.mxu1 %v2381_v40  ;;  %1965 = vmatmul.mubr.f32.gmra.mxu0 %v1928_v6 }
 0x805   :  { %1975 = vmatprep.mubr.msk.f32.mxu0 %vm103_vm0, %v2272_v14 }
 0x807   :  { %1141 = vmatmul.mubr.f32.gmra.mxu1 %v924_v22 }
 0x808   :  { %1145 = vmatprep.mubr.f32.mxu1 %v2376_v38 }
 0x80b   :  { %1146 = vmatmul.mubr.f32.gmra.mxu1 %v1914_v41 }
 0x80c   :  { %1989 = vmatprep.mubr.msk.f32.mxu1 %vm103_vm0, %v2272_v14 }
 0x8bf   :  { %v1759_v21 = vpop.f32.mrf.mxu1 }
 0x8c0   :  { %v1963_v43 = vpop.f32.mrf.mxu0 }
 0x8c1   :  { %v1760_v25 = vpop.f32.mrf.mxu1 }
 0x8c2   :  { %v1217_v45 = vpop.f32.mrf.mxu0  ;;  %v1761_v49 = vadd.f32 %v1760_v25, %v1759_v21 }
 0x8c3   :  { %v1762_v42 = vpop.f32.mrf.mxu1 }
 0x8c4   :  { %v1966_v46 = vpop.f32.mrf.mxu0  ;;  %v2425_v50 = vadd.f32 %v1761_v49, %v1217_v45 }
 0x8c5   :  { %v1763_v4 = vpop.f32.mrf.mxu1 }
 0x8c6   :  { %v1227_v47 = vpop.f32.mrf.mxu0  ;;  %v1764_v48 = vadd.f32 %v1763_v4, %v1762_v42 }
 0x8c7   :  { %v1765_v44 = vpop.f32.mrf.mxu1 }
 0x8c8   :  { %v2421_v14 = vadd.f32 %v1963_v43, %v1764_v48 }
 0x8c9   :  { %v1766_v40 = vpop.f32.mrf.mxu1 }
 0x8ca   :  { %v1767_v8 = vadd.f32 %v1766_v40, %v1765_v44 }
 0x8cb   :  { %v1768_v5 = vpop.f32.mrf.mxu1 }
 0x8cc   :  { %v2417_v12 = vadd.f32 %v1767_v8, %v1227_v47 }
 0x8cd   :  { %v1769_v7 = vpop.f32.mrf.mxu1 }
 0x8ce   :  { %v1770_v10 = vadd.f32 %v1769_v7, %v1768_v5 }
 0x8d0   :  { %v2415_v38 = vadd.f32 %v1966_v46, %v1770_v10 }
 0x8d2   :  { %1967 = vmatprep.subr.mxu0 %v2415_v38 }
 0x8d3   :  { %1968 = vmatpush3.msra.mxu0 %v2415_v38 }
 0x8d4   :  { %1969 = vmatprep.subr.mxu0 %v2417_v12 }
 0x8d5   :  { %1970 = vmatpush3.msra.mxu0 %v2417_v12 }
 0x8d6   :  { %1971 = vmatprep.subr.mxu0 %v2421_v14 }
 0x8d7   :  { %1972 = vmatpush3.msra.mxu0 %v2421_v14 }
 0x8d8   :  { %1973 = vmatprep.subr.mxu0 %v2425_v50 }
 0x8d9   :  { %1974 = vmatpush3.msra.mxu0 %v2425_v50 }
 0x8da   :  { %1976 = vmatmul.mubr.msk.f32.vlgmr.msra.gmra.mxu0 %vm103_vm0, %v2292_v33 }
 0x8db   :  { %1978 = vmatprep.mubr.msk.f32.mxu0 %vm103_vm0, %v2295_v34 }
 0x8de   :  { %1979 = vmatmul.mubr.msk.f32.gmra.mxu0 %vm103_vm0, %v2302_v35 }
 0x99a   :  { %v1977_v16 = vpop.f32.mrf.mxu0 }
 0x99c   :  { %v1304_v51 = vpop.f32.mrf.mxu0 }
 0x99e   :  { %v1980_v52 = vpop.f32.mrf.mxu0 }
 0x99f   :  { %1329 = vrot.lane.b32.xlu0 %v1980_v52, %s2136_s11 }
 0x9a0   :  { %v1314_v53 = vpop.f32.mrf.mxu0 }
 0x9a1   :  { %1327 = vrot.lane.b32.xlu1 %v1314_v53, %s2136_s11 }
 0x9a3   :  { %1325 = vrot.lane.b32.xlu0 %v1977_v16, %s2136_s11 }
 0x9a5   :  { %1323 = vrot.lane.b32.xlu1 %v1304_v51, %s2136_s11 }
 0xa11   :  { %v1330_v54 = vpop.permute.xlu0 %1329 }
 0xa12   :  { %v1334_v55 = vadd.f32 %v1980_v52, %v1330_v54 }
 0xa13   :  { %v1328_v56 = vpop.permute.xlu1 %1327 }
 0xa14   :  { %v1333_v57 = vadd.f32 %v1328_v56, %v1314_v53  ;;  %1341 = vrot.lane.b32.xlu0 %v1334_v55, %s2139_s2 }
 0xa15   :  { %v1326_v58 = vpop.permute.xlu0 %1325 }
 0xa16   :  { %v1332_v59 = vadd.f32 %v1977_v16, %v1326_v58  ;;  %1339 = vrot.lane.b32.xlu1 %v1333_v57, %s2139_s2 }
 0xa17   :  { %v1324_v60 = vpop.permute.xlu1 %1323 }
 0xa18   :  { %v1331_v61 = vadd.f32 %v1324_v60, %v1304_v51  ;;  %1337 = vrot.lane.b32.xlu0 %v1332_v59, %s2139_s2 }
 0xa1a   :  { %1335 = vrot.lane.b32.xlu1 %v1331_v61, %s2139_s2 }
 0xa86   :  { %v1342_v62 = vpop.permute.xlu0 %1341 }
 0xa87   :  { %v1346_v63 = vadd.f32 %v1342_v62, %v1334_v55 }
 0xa88   :  { %v1340_v3 = vpop.permute.xlu1 %1339 }
 0xa89   :  { %v1345_v9 = vadd.f32 %v1340_v3, %v1333_v57  ;;  %1353 = vrot.lane.b32.xlu0 %v1346_v63, %s2140_s3 }
 0xa8a   :  { %v1338_v11 = vpop.permute.xlu0 %1337 }
 0xa8b   :  { %v1344_v13 = vadd.f32 %v1338_v11, %v1332_v59  ;;  %1351 = vrot.lane.b32.xlu1 %v1345_v9, %s2140_s3 }
 0xa8c   :  { %v1336_v15 = vpop.permute.xlu1 %1335 }
 0xa8d   :  { %v1343_v17 = vadd.f32 %v1336_v15, %v1331_v61  ;;  %1349 = vrot.lane.b32.xlu0 %v1344_v13, %s2140_s3 }
 0xa8f   :  { %1347 = vrot.lane.b32.xlu1 %v1343_v17, %s2140_s3 }
 0xafb   :  { %v1354_v1 = vpop.permute.xlu0 %1353 }
 0xafc   :  { %v1358_v18 = vadd.f32 %v1354_v1, %v1346_v63 }
 0xafd   :  { %v1352_v19 = vpop.permute.xlu1 %1351 }
 0xafe   :  { %v1357_v20 = vadd.f32 %v1352_v19, %v1345_v9  ;;  %1365 = vrot.lane.b32.xlu0 %v1358_v18, %s2141_s25 }
 0xaff   :  { %v1350_v23 = vpop.permute.xlu0 %1349 }
 0xb00   :  { %v1356_v0 = vadd.f32 %v1350_v23, %v1344_v13  ;;  %1363 = vrot.lane.b32.xlu1 %v1357_v20, %s2141_s25 }
 0xb01   :  { %v1348_v24 = vpop.permute.xlu1 %1347 }
 0xb02   :  { %v1355_v26 = vadd.f32 %v1348_v24, %v1343_v17  ;;  %1361 = vrot.lane.b32.xlu0 %v1356_v0, %s2141_s25 }
 0xb04   :  { %1359 = vrot.lane.b32.xlu1 %v1355_v26, %s2141_s25 }
 0xb70   :  { %v1366_v27 = vpop.permute.xlu0 %1365 }
 0xb71   :  { %v1370_v28 = vadd.f32 %v1366_v27, %v1358_v18  ;;  %v1613_v27 = vld [vmem:[%s2517_s6] ss:$0 sm:$0xff]  ;;  %s2142_s6 = smov [#allocation10]  }
 0xb72   :  { %v1364_v29 = vpop.permute.xlu1 %1363 }
 0xb73   :  { %v1374_v30 = vmul.f32 0.00390625, %v1370_v28  ;;  %v1369_v31 = vadd.f32 %v1364_v29, %v1357_v20 }
 0xb74   :  { %v1362_v32 = vpop.permute.xlu0 %1361 }
 0xb75   :  { %v2454_v36 = vsub.f32 %v2415_v38, %v1374_v30  ;;  %v1373_v37 = vmul.f32 0.00390625, %v1369_v31  ;;  %v1368_v39 = vadd.f32 %v1362_v32, %v1356_v0  ;;  %v1614_v31 = vld [vmem:[%s2518_s7] ss:$0 sm:$0xff]  ;;  %s1565_s7 = sshll.u32 %s2142_s6, 4  ;;  %s1566_s7 = int_to_ptr.vmem [resolvable:$true] %s1565_s7 }
 0xb76   :  { %v1360_v6 = vpop.permute.xlu1 %1359  ;;  %s2105_s12 = scalar_lea.vmem %s1566_s7, 512  ;;  %p2110_p7 = scmp.lt.s32.totalorder %s1566_s7, %s1566_s7 }
 0xb77   :  { %v2457_v41 = vsub.f32 %v2417_v12, %v1373_v37  ;;  %v1372_v2 = vmul.f32 0.00390625, %v1368_v39  ;;  %v1367_v22 = vadd.f32 %v1360_v6, %v1355_v26  ;;  %v1382_v21 = vmul.f32 %v2454_v36, %v2454_v36  ;;  %p2106_p6 = scmp.ne.s32.totalorder %s1566_s7, %s2105_s12  ;;  %p2111_p8 = scmp.lt.s32.totalorder %s2105_s12, %s2105_s12 }
 0xb79   :  { %v2462_v25 = vsub.f32 %v2421_v14, %v1372_v2  ;;  %v1371_v42 = vmul.f32 0.00390625, %v1367_v22  ;;  %1981 = vmatprep.subr.mxu1 %v1382_v21  ;;  %v1381_v43 = vmul.f32 %v2457_v41, %v2457_v41  ;;  %p2112_p9 = por %p2111_p8, %p2110_p7 }
 0xb7a   :  { %1982 = vmatpush3.msra.mxu1 %v1382_v21 }
 0xb7b   :  { %v2467_v4 = vsub.f32 %v2425_v50, %v1371_v42  ;;  %1983 = vmatprep.subr.mxu1 %v1381_v43  ;;  %v1380_v44 = vmul.f32 %v2462_v25, %v2462_v25  ;;  %p2113_p10 = pnand %p2112_p9, %p2106_p6 }
 0xb7c   :  { %1984 = vmatpush3.msra.mxu1 %v1381_v43 }
 0xb7d   :  { %1985 = vmatprep.subr.mxu1 %v1380_v44  ;;  %v1379_v45 = vmul.f32 %v2467_v4, %v2467_v4 }
 0xb7e   :  { %1986 = vmatpush3.msra.mxu1 %v1380_v44 }
 0xb7f   :  { %1987 = vmatprep.subr.mxu1 %v1379_v45 }
 0xb80   :  { %1988 = vmatpush3.msra.mxu1 %v1379_v45  ;;  %v2021_v45 = vld [vmem:[#allocation2 + $0x8] sm:$0xff] }
 0xb81   :  { %1990 = vmatmul.mubr.msk.f32.vlgmr.msra.gmra.mxu1 %vm103_vm0, %v2292_v33 }
 0xb82   :  { %1992 = vmatprep.mubr.msk.f32.mxu1 %vm103_vm0, %v2295_v34 }
 0xb85   :  { %1993 = vmatmul.mubr.msk.f32.gmra.mxu1 %vm103_vm0, %v2302_v35 }
 0xc41   :  { %v1991_v40 = vpop.f32.mrf.mxu1 }
 0xc42   :  { %1470 = vrot.lane.b32.xlu1 %v1991_v40, %s2136_s11 }
 0xc43   :  { %v1449_v46 = vpop.f32.mrf.mxu1 }
 0xc44   :  { %1468 = vrot.lane.b32.xlu0 %v1449_v46, %s2136_s11 }
 0xc45   :  { %v1994_v5 = vpop.f32.mrf.mxu1 }
 0xc46   :  { %1474 = vrot.lane.b32.xlu1 %v1994_v5, %s2136_s11 }
 0xc47   :  { %v1459_v7 = vpop.f32.mrf.mxu1 }
 0xc48   :  { %1472 = vrot.lane.b32.xlu0 %v1459_v7, %s2136_s11 }
 0xcb4   :  { %v1471_v8 = vpop.permute.xlu1 %1470 }
 0xcb5   :  { %v1477_v33 = vadd.f32 %v1991_v40, %v1471_v8 }
 0xcb6   :  { %v1469_v10 = vpop.permute.xlu0 %1468 }
 0xcb7   :  { %v1476_v47 = vadd.f32 %v1469_v10, %v1449_v46  ;;  %1482 = vrot.lane.b32.xlu1 %v1477_v33, %s2139_s2 }
 0xcb8   :  { %v1475_v34 = vpop.permute.xlu1 %1474 }
 0xcb9   :  { %v1479_v35 = vadd.f32 %v1994_v5, %v1475_v34  ;;  %1480 = vrot.lane.b32.xlu0 %v1476_v47, %s2139_s2 }
 0xcba   :  { %v1473_v48 = vpop.permute.xlu0 %1472 }
 0xcbb   :  { %v1478_v38 = vadd.f32 %v1473_v48, %v1459_v7  ;;  %1486 = vrot.lane.b32.xlu1 %v1479_v35, %s2139_s2  ;;  %v2022_v7 = vld [vmem:[#allocation2] sm:$0xff] }
 0xcbd   :  { %1484 = vrot.lane.b32.xlu0 %v1478_v38, %s2139_s2 }
 0xd29   :  { %v1483_v49 = vpop.permute.xlu1 %1482 }
 0xd2a   :  { %v1489_v12 = vadd.f32 %v1483_v49, %v1477_v33  ;;  %v2023_v33 = vld [vmem:[#allocation2 + $0x18] sm:$0xff] }
 0xd2b   :  { %v1481_v14 = vpop.permute.xlu0 %1480 }
 0xd2c   :  { %v1488_v50 = vadd.f32 %v1481_v14, %v1476_v47  ;;  %1494 = vrot.lane.b32.xlu1 %v1489_v12, %s2140_s3 }
 0xd2d   :  { %v1487_v16 = vpop.permute.xlu1 %1486 }
 0xd2e   :  { %v1491_v51 = vadd.f32 %v1487_v16, %v1479_v35  ;;  %1492 = vrot.lane.b32.xlu0 %v1488_v50, %s2140_s3 }
 0xd2f   :  { %v1485_v52 = vpop.permute.xlu0 %1484 }
 0xd30   :  { %v1490_v53 = vadd.f32 %v1485_v52, %v1478_v38  ;;  %1498 = vrot.lane.b32.xlu1 %v1491_v51, %s2140_s3 }
 0xd32   :  { %1496 = vrot.lane.b32.xlu0 %v1490_v53, %s2140_s3 }
 0xd9e   :  { %v1495_v54 = vpop.permute.xlu1 %1494 }
 0xd9f   :  { %v1501_v55 = vadd.f32 %v1495_v54, %v1489_v12 }
 0xda0   :  { %v1493_v56 = vpop.permute.xlu0 %1492 }
 0xda1   :  { %v1500_v57 = vadd.f32 %v1493_v56, %v1488_v50  ;;  %1506 = vrot.lane.b32.xlu1 %v1501_v55, %s2141_s25 }
 0xda2   :  { %v1499_v58 = vpop.permute.xlu1 %1498 }
 0xda3   :  { %v1503_v59 = vadd.f32 %v1499_v58, %v1491_v51  ;;  %1504 = vrot.lane.b32.xlu0 %v1500_v57, %s2141_s25 }
 0xda4   :  { %v1497_v60 = vpop.permute.xlu0 %1496 }
 0xda5   :  { %v1502_v61 = vadd.f32 %v1497_v60, %v1490_v53  ;;  %1510 = vrot.lane.b32.xlu1 %v1503_v59, %s2141_s25 }
 0xda7   :  { %1508 = vrot.lane.b32.xlu0 %v1502_v61, %s2141_s25 }
 0xe13   :  { %v1507_v62 = vpop.permute.xlu1 %1506 }
 0xe14   :  { %v1513_v63 = vadd.f32 %v1507_v62, %v1501_v55 }
 0xe15   :  { %v1505_v3 = vpop.permute.xlu0 %1504 }
 0xe16   :  { %v1517_v9 = vmul.f32 0.00390625, %v1513_v63  ;;  %v1512_v11 = vadd.f32 %v1505_v3, %v1500_v57 }
 0xe17   :  { %v1511_v13 = vpop.permute.xlu1 %1510 }
 0xe18   :  { %v1521_v15 = vadd.f32 1e-05, %v1517_v9  ;;  %v1516_v17 = vmul.f32 0.00390625, %v1512_v11  ;;  %v1515_v1 = vadd.f32 %v1511_v13, %v1503_v59 }
 0xe19   :  { %v1509_v18 = vpop.permute.xlu0 %1508 }
 0xe1a   :  { %2013 = vrsqrt.f32 %v1521_v15  ;;  %v1520_v19 = vadd.f32 1e-05, %v1516_v17  ;;  %v1519_v20 = vmul.f32 0.00390625, %v1515_v1  ;;  %v1514_v23 = vadd.f32 %v1509_v18, %v1502_v61 }
 0xe1c   :  { %2015 = vrsqrt.f32 %v1520_v19  ;;  %v1523_v0 = vadd.f32 1e-05, %v1519_v20  ;;  %v1518_v24 = vmul.f32 0.00390625, %v1514_v23 }
 0xe1e   :  { %2017 = vrsqrt.f32 %v1523_v0  ;;  %v1522_v26 = vadd.f32 1e-05, %v1518_v24 }
 0xe20   :  { %2019 = vrsqrt.f32 %v1522_v26 }
 0xe27   :  { %v2014_v28 = vpop.eup %2013 }
 0xe28   :  { %v1535_v29 = vmul.f32 %v2014_v28, %v1613_v27 }
 0xe29   :  { %v2016_v30 = vpop.eup %2015 }
 0xe2a   :  { %v1534_v32 = vmul.f32 %v2016_v30, %v1613_v27  ;;  %v1539_v37 = vmul.f32 %v1535_v29, %v2462_v25 }
 0xe2b   :  { %v2018_v39 = vpop.eup %2017 }
 0xe2c   :  { %v1537_v6 = vmul.f32 %v2018_v39, %v1613_v27  ;;  %v1538_v2 = vmul.f32 %v1534_v32, %v2467_v4  ;;  %v1549_v22 = vadd.f32 %v1614_v31, %v1539_v37  ;;  %v2024_v4 = vld [vmem:[#allocation2 + $0x10] sm:$0xff] }
 0xe2d   :  { %v2020_v21 = vpop.eup %2019 }
 0xe2e   :  { %v1536_v42 = vmul.f32 %v2020_v21, %v1613_v27  ;;  %v1541_v43 = vmul.f32 %v1537_v6, %v2454_v36  ;;  %v1548_v44 = vadd.f32 %v1614_v31, %v1538_v2  ;;  %v1553_v40 = vadd.f32 %v2021_v45, %v1549_v22 }
 0xe30   :  { %v1540_v46 = vmul.f32 %v1536_v42, %v2457_v41  ;;  %v1551_v5 = vadd.f32 %v1614_v31, %v1541_v43  ;;  %v1552_v8 = vadd.f32 %v2022_v7, %v1548_v44  ;;  %1557 = vst [vmem:[#allocation10 + $0x8] sm:$0xff] %v1553_v40 }
 0xe32   :  { %v1550_v25 = vadd.f32 %v1614_v31, %v1540_v46  ;;  %v1555_v10 = vadd.f32 %v2023_v33, %v1551_v5  ;;  %1556 = vst [vmem:[#allocation10] sm:$0xff] %v1552_v8 }
 0xe34   :  { %v1554_v47 = vadd.f32 %v2024_v4, %v1550_v25  ;;  %1559 = vst [vmem:[#allocation10 + $0x18] sm:$0xff] %v1555_v10 }
 0xe36   :  { %1558 = vst [vmem:[#allocation10 + $0x10] sm:$0xff] %v1554_v47 }
 0xe37   :  { %2116 = shalt.err (!%p2113_p10)
}
 0xe38   :  { %1571 = dma.vmem_to_hbm [thread:$0]  %s1566_s7, 512, %s2519_s8, [#allocation4], %s2135_s10, %s2135_s10, %s2136_s11  }
 0xe39   :  { %2131 = dma.done.wait [#allocation4], 512  }
 0xe3a   :  { %2132 = vsyncadd [#allocation4], 4294966784 }
 0xe3b   :  { %1575 = vsyncpa [#allocation3], 1 }
 0xe3c   :  { %1576 = vsyncpa [#allocation6], 1 }
 0xe3d   :  { %1577 = vsyncpa [#allocation9], 1 }
 0xe3e   :  { %1578 = vsyncpa [#allocation4], 1 }

</bundles_post_ra>
